<compile_context>
chip_gen: v7x
topology: tpu7x:2x2x1
jax: 0.10.0
libtpu: 0.0.40
codegen_flags: <defaults>
</compile_context>

<pallas_src>
import functools

import jax
import jax.numpy as jnp
from jax.experimental import pallas as pl
from jax.experimental.pallas import tpu as pltpu

LANE = 128                      # TPU lane width: pad every channel dim to a multiple of this
_VMEM_LIMIT = 48 * 1024 * 1024  # explicit scoped-VMEM budget (fits v7x's 64 MiB physical VMEM)


# --------------------------------------------------------------------------- helpers
def _round_up(x, m):
    return (x + m - 1) // m * m


def _pad_to(a, shape):
    pads = [(0, t - s) for s, t in zip(a.shape, shape)]
    if all(p == (0, 0) for p in pads):
        return a
    return jnp.pad(a, pads)


def _choose_row_block(m, target=512):
    """Row-tile for the flat (rows, channels) matmul kernel.

    Large tiles amortize the ~0.35us per-grid-step overhead; M is padded up to a tile
    multiple so tiles never fall below the 8-sublane minimum.  When there is enough work
    we keep >= 2 grid steps so v7x's two TensorCores both get a share.
    """
    m8 = _round_up(max(m, 8), 8)
    bm = min(target, m8)
    if m8 // bm < 2 and m8 >= 16:
        bm = _round_up(m8 // 2, 8)
    return bm, _round_up(m, bm)


def bn_fold(gamma, beta, mean, var, eps=1e-5):
    """Inference-mode BatchNorm -> per-channel scale/shift."""
    scale = gamma / jnp.sqrt(var + eps)
    shift = beta - mean * scale
    return scale, shift


# --------------------------------------------------------------------------- stage 1
# y1 = relu( relu(x * s1 + t1) @ w1' + c1 )
#   w1' = w1 * bn2_scale (bn2 folded into conv1), c1 = b1 * bn2_scale + bn2_shift.
# bn1 sits *before* the conv with a ReLU in between, so its scale/shift cannot be folded
# into w1 and stays as the only per-channel prologue.
def _stage1_kernel(x_ref, w_ref, s_ref, t_ref, c_ref, o_ref):
    h = jnp.maximum(x_ref[...].astype(jnp.float32) * s_ref[...] + t_ref[...], 0.0)
    y = jnp.dot(h.astype(w_ref.dtype), w_ref[...], preferred_element_type=jnp.float32)
    y = jnp.maximum(y + c_ref[...], 0.0)
    o_ref[...] = y.astype(o_ref.dtype)


def _stage1_call(x_flat, w, s_pre, t_pre, c_post, *, block_rows, out_dtype):
    mp, kp = x_flat.shape
    cp = w.shape[1]
    return pl.pallas_call(
        _stage1_kernel,
        out_shape=jax.ShapeDtypeStruct((mp, cp), out_dtype),
        grid_spec=pltpu.PrefetchScalarGridSpec(
            num_scalar_prefetch=0,
            grid=(mp // block_rows,),
            in_specs=[
                pl.BlockSpec((block_rows, kp), lambda i: (i, 0)),
                pl.BlockSpec((kp, cp), lambda i: (0, 0)),      # constant-index weight block
                pl.BlockSpec((1, kp), lambda i: (0, 0)),
                pl.BlockSpec((1, kp), lambda i: (0, 0)),
                pl.BlockSpec((1, cp), lambda i: (0, 0)),
            ],
            out_specs=pl.BlockSpec((block_rows, cp), lambda i: (i, 0)),
        ),
        compiler_params=pltpu.CompilerParams(
            dimension_semantics=("parallel",),
            vmem_limit_bytes=_VMEM_LIMIT,
        ),
    )(x_flat, w, s_pre, t_pre, c_post)


# --------------------------------------------------------------------------- stage 2
# Fused: conv2(3x3, stride) -> bn3 -> relu -> conv3(1x1) -> + skip(x)
# One grid step per image; the halo'd conv1 output stays resident in VMEM and the 3x3
# conv is computed as 9 shifted tap matmuls (no im2col expansion).  The input is
# pre-split into `stride` column phases so every in-kernel read is a contiguous sublane
# slice at a dynamic row offset (maximally robust lowering).
def _stage2_kernel(y_ref, xs_ref, w2_ref, c2_ref, w3_ref, b3_ref, o_ref, *, stride):
    _, ho, wo, cout_p = o_ref.shape
    c4p = w2_ref.shape[-1]
    cin_p = xs_ref.shape[-1]
    mm_dtype = w2_ref.dtype

    @pl.loop(0, ho)
    def _row(r):
        acc = jnp.zeros((wo, c4p), jnp.float32)
        for kh in range(3):
            row = r * stride + kh
            for kw in range(3):
                tap = y_ref[0, row, kw % stride, pl.ds(kw // stride, wo), :]
                acc = acc + jnp.dot(tap, w2_ref[kh * 3 + kw],
                                    preferred_element_type=jnp.float32)
        z = jnp.maximum(acc + c2_ref[...], 0.0)                  # folded bn3 + relu (f32)
        out = jnp.dot(z.astype(mm_dtype), w3_ref[...],
                      preferred_element_type=jnp.float32) + b3_ref[...]
        skip = xs_ref[0, r].astype(jnp.float32)                  # (wo, cin_p), f32 residual
        if cin_p == cout_p:
            out = out + skip
        else:  # zero-filled extra shortcut channels, built in VMEM (never written to HBM)
            out = out + jnp.concatenate(
                [skip, jnp.zeros((wo, cout_p - cin_p), jnp.float32)], axis=-1)
        o_ref[0, r] = out.astype(o_ref.dtype)


def _stage2_call(y_ph, x_skip, w2, c2, w3, b3, *, stride, out_dtype):
    n, hp, s, wq, c4p = y_ph.shape
    _, ho, wo, cin_p = x_skip.shape
    cout_p = w3.shape[1]
    kernel = functools.partial(_stage2_kernel, stride=stride)
    return pl.pallas_call(
        kernel,
        out_shape=jax.ShapeDtypeStruct((n, ho, wo, cout_p), out_dtype),
        grid_spec=pltpu.PrefetchScalarGridSpec(
            num_scalar_prefetch=0,
            grid=(n,),
            in_specs=[
                pl.BlockSpec((1, hp, s, wq, c4p), lambda i: (i, 0, 0, 0, 0)),
                pl.BlockSpec((1, ho, wo, cin_p), lambda i: (i, 0, 0, 0)),
                pl.BlockSpec((9, c4p, c4p), lambda i: (0, 0, 0)),
                pl.BlockSpec((1, c4p), lambda i: (0, 0)),
                pl.BlockSpec((c4p, cout_p), lambda i: (0, 0)),
                pl.BlockSpec((1, cout_p), lambda i: (0, 0)),
            ],
            out_specs=pl.BlockSpec((1, ho, wo, cout_p), lambda i: (i, 0, 0, 0)),
        ),
        compiler_params=pltpu.CompilerParams(
            dimension_semantics=("parallel",),
            vmem_limit_bytes=_VMEM_LIMIT,
        ),
    )(y_ph, x_skip, w2, c2, w3, b3)


# --------------------------------------------------------------------------- forward
def bottleneck_v2_forward_nhwc(x, params, *, downsample=False, matmul_dtype=jnp.bfloat16):
    """BottleNeckBlockV2.forward in NHWC (eval mode, drop_probability=0)."""
    n, h, w, cin = x.shape
    c4 = params["w1"].shape[1]
    cout = params["w3"].shape[1]
    stride = 2 if downsample else 1

    # BN running-stat folding.  bn2/bn3 act directly on conv1/conv2 outputs -> fold their
    # scale into the conv weights and the rest into a single per-channel constant.
    s1, t1 = bn_fold(*params["bn1"])
    s2, t2 = bn_fold(*params["bn2"])
    s3, t3 = bn_fold(*params["bn3"])
    w1f = params["w1"] * s2[None, :]
    c1 = params["b1"] * s2 + t2
    w2f = params["w2"] * s3[None, None, None, :]
    c2 = params["b2"] * s3 + t3

    # Lane-width (128) channel padding -> lane-dense, unmasked stores and full MXU width.
    cin_p = _round_up(cin, LANE)
    c4_p = _round_up(c4, LANE)
    cout_p = _round_up(cout, LANE)

    x_p = _pad_to(x.astype(jnp.float32), (n, h, w, cin_p))        # residual path stays f32
    w1_p = _pad_to(w1f, (cin_p, c4_p)).astype(matmul_dtype)
    s1_p = _pad_to(s1.reshape(1, cin), (1, cin_p))
    t1_p = _pad_to(t1.reshape(1, cin), (1, cin_p))
    c1_p = _pad_to(c1.reshape(1, c4), (1, c4_p))
    w2_p = _pad_to(w2f.reshape(9, c4, c4), (9, c4_p, c4_p)).astype(matmul_dtype)
    c2_p = _pad_to(c2.reshape(1, c4), (1, c4_p))
    w3_p = _pad_to(params["w3"], (c4_p, cout_p)).astype(matmul_dtype)
    b3_p = _pad_to(params["b3"].reshape(1, cout), (1, cout_p))

    # -- stage 1: bn1 -> relu -> conv1(1x1) -> bn2 -> relu   (one fused matmul kernel) ---
    m = n * h * w
    bm, mp = _choose_row_block(m)
    x_flat = x_p.reshape(m, cin_p).astype(matmul_dtype)
    if mp > m:
        x_flat = jnp.pad(x_flat, ((0, mp - m), (0, 0)))
    y1 = _stage1_call(x_flat, w1_p, s1_p, t1_p, c1_p, block_rows=bm, out_dtype=matmul_dtype)
    y1 = y1[:m].reshape(n, h, w, c4_p)

    # -- XLA glue: 1-pixel zero halo (conv pad=1) + column-phase split for the stride ----
    hp, wp = h + 2, w + 2
    wq = pl.cdiv(wp, stride)
    y1 = jnp.pad(y1, ((0, 0), (1, 1), (1, 1 + stride * wq - wp), (0, 0)))
    y_ph = y1.reshape(n, hp, wq, stride, c4_p).transpose(0, 1, 3, 2, 4)
    # AvgPool2d(kernel_size=1, stride) == spatial subsample of the shortcut input.
    x_skip = x_p[:, ::stride, ::stride, :]

    # -- stage 2: conv2(3x3) -> bn3 -> relu -> conv3(1x1) -> + skip (one fused kernel) ---
    out = _stage2_call(y_ph, x_skip, w2_p, c2_p, w3_p, b3_p,
                       stride=stride, out_dtype=jnp.float32)
    return out[..., :cout].astype(x.dtype)


def bottleneck_v2_forward(x_nchw, params, *, downsample=False, matmul_dtype=jnp.bfloat16):
    # TODO(synk): keep activations NHWC end-to-end in the surrounding network; these two
    # transposes exist only to match the PyTorch NCHW interface.
    x = jnp.transpose(x_nchw, (0, 2, 3, 1))
    out = bottleneck_v2_forward_nhwc(x, params, downsample=downsample,
                                     matmul_dtype=matmul_dtype)
    return jnp.transpose(out, (0, 3, 1, 2))


# --------------------------------------------------------------------------- reference
def bottleneck_v2_reference(x_nchw, params, *, downsample=False):
    """Pure-JAX f32 reference of BottleNeckBlockV2.forward (eval mode)."""
    x = jnp.transpose(x_nchw, (0, 2, 3, 1)).astype(jnp.float32)
    s1, t1 = bn_fold(*params["bn1"])
    s2, t2 = bn_fold(*params["bn2"])
    s3, t3 = bn_fold(*params["bn3"])
    stride = 2 if downsample else 1
    hi = jax.lax.Precision.HIGHEST

    y = jnp.maximum(x * s1 + t1, 0.0)
    y = jnp.einsum("nhwc,cd->nhwd", y, params["w1"], precision=hi) + params["b1"]
    y = jnp.maximum(y * s2 + t2, 0.0)
    y = jax.lax.conv_general_dilated(
        y, params["w2"], window_strides=(stride, stride), padding=((1, 1), (1, 1)),
        dimension_numbers=("NHWC", "HWIO", "NHWC"), precision=hi) + params["b2"]
    y = jnp.maximum(y * s3 + t3, 0.0)
    y = jnp.einsum("nhwc,cd->nhwd", y, params["w3"], precision=hi) + params["b3"]

    xs = x[:, ::stride, ::stride, :] if downsample else x
    cin, cout = x.shape[-1], params["w3"].shape[1]
    if cout != cin:
        xs = jnp.pad(xs, ((0, 0), (0, 0), (0, 0), (0, cout - cin)))
    out = y + xs                                  # drop_path(p=0) == identity, no final relu
    return jnp.transpose(out, (0, 3, 1, 2))


# --------------------------------------------------------------------------- parameters
def init_bottleneck_v2_params(key, in_channels, out_channels, dtype=jnp.float32):
    c4 = out_channels // 4
    ks = jax.random.split(key, 18)

    def norm(k, shape, s=0.1):
        return (s * jax.random.normal(k, shape)).astype(dtype)

    def bn_params(k0, k1, k2, k3, n):   # (gamma, beta, running_mean, running_var)
        return (1.0 + norm(k0, (n,)), norm(k1, (n,)),
                norm(k2, (n,)), 1.0 + jnp.abs(norm(k3, (n,))))

    return {
        "w1": norm(ks[0], (in_channels, c4)),        # conv1 1x1 as (Cin, C/4) matmul weight
        "b1": norm(ks[1], (c4,)),
        "w2": norm(ks[2], (3, 3, c4, c4)),           # conv2 3x3 in HWIO layout
        "b2": norm(ks[3], (c4,)),
        "w3": norm(ks[4], (c4, out_channels)),       # conv3 1x1 as (C/4, Cout) matmul weight
        "b3": norm(ks[5], (out_channels,)),
        "bn1": bn_params(ks[6], ks[7], ks[8], ks[9], in_channels),     # V2: bn1 over Cin
        "bn2": bn_params(ks[10], ks[11], ks[12], ks[13], c4),
        "bn3": bn_params(ks[14], ks[15], ks[16], ks[17], c4),          # V2: bn3 over C/4
    }


# --------------------------------------------------------------------------- main
if __name__ == "__main__":
    key = jax.random.PRNGKey(0)
    k_x, k_p = jax.random.split(key)

    N, Cin, H, W = 2, 8, 16, 16
    Cout = 16

    x = jax.random.normal(k_x, (N, Cin, H, W), dtype=jnp.float32)
    params = init_bottleneck_v2_params(k_p, Cin, Cout)

    for downsample in (True, False):
        fwd = jax.jit(functools.partial(bottleneck_v2_forward, downsample=downsample))
        out = jax.block_until_ready(fwd(x, params))

        expected = (N, Cout, H // 2, W // 2) if downsample else (N, Cout, H, W)
        assert out.shape == expected, (out.shape, expected)

        ref = bottleneck_v2_reference(x, params, downsample=downsample)
        err = float(jnp.max(jnp.abs(out - ref)))
        assert err < 5e-2, f"max abs err {err} (downsample={downsample})"

    print("KERNEL_OK")
</pallas_src>

<mosaic_0001>
module attributes {stable_mosaic.version = 11 : i64} {
  func.func @_stage1_kernel(%arg0: i32, %arg1: memref<256x128xbf16, #tpu.memory_space<vmem>>, %arg2: memref<128x128xbf16, #tpu.memory_space<vmem>>, %arg3: memref<1x128xf32, #tpu.memory_space<vmem>>, %arg4: memref<1x128xf32, #tpu.memory_space<vmem>>, %arg5: memref<1x128xf32, #tpu.memory_space<vmem>>, %arg6: memref<256x128xbf16, #tpu.memory_space<vmem>>) attributes {dimension_semantics = [#tpu.dimension_semantics<parallel>], iteration_bounds = array<i64: 2>, scalar_prefetch = 0 : i64, scratch_operands = 0 : i64, tpu.core_type = #tpu.core_type<tc>, window_params = [{transform_indices = @transform_0, window_bounds = array<i64: 256, 128>}, {pipeline_mode = #tpu.pipeline_mode<synchronous>, transform_indices = @transform_1, window_bounds = array<i64: 128, 128>}, {pipeline_mode = #tpu.pipeline_mode<synchronous>, transform_indices = @transform_2, window_bounds = array<i64: 1, 128>}, {pipeline_mode = #tpu.pipeline_mode<synchronous>, transform_indices = @transform_3, window_bounds = array<i64: 1, 128>}, {pipeline_mode = #tpu.pipeline_mode<synchronous>, transform_indices = @transform_4, window_bounds = array<i64: 1, 128>}, {transform_indices = @transform_5, window_bounds = array<i64: 256, 128>}]} {
    %c0 = arith.constant 0 : index
    %c0_0 = arith.constant 0 : index
    %0 = vector.load %arg1[%c0, %c0_0] : memref<256x128xbf16, #tpu.memory_space<vmem>>, vector<256x128xbf16>
    %1 = arith.extf %0 : vector<256x128xbf16> to vector<256x128xf32>
    %c0_1 = arith.constant 0 : index
    %c0_2 = arith.constant 0 : index
    %2 = vector.load %arg3[%c0_1, %c0_2] : memref<1x128xf32, #tpu.memory_space<vmem>>, vector<1x128xf32>
    %3 = vector.broadcast %2 : vector<1x128xf32> to vector<256x128xf32>
    %4 = arith.mulf %1, %3 : vector<256x128xf32>
    %c0_3 = arith.constant 0 : index
    %c0_4 = arith.constant 0 : index
    %5 = vector.load %arg4[%c0_3, %c0_4] : memref<1x128xf32, #tpu.memory_space<vmem>>, vector<1x128xf32>
    %6 = vector.broadcast %5 : vector<1x128xf32> to vector<256x128xf32>
    %7 = arith.addf %4, %6 : vector<256x128xf32>
    %cst = arith.constant 0.000000e+00 : f32
    %8 = vector.broadcast %cst : f32 to vector<256x128xf32>
    %9 = arith.maximumf %7, %8 : vector<256x128xf32>
    %10 = arith.truncf %9 : vector<256x128xf32> to vector<256x128xbf16>
    %c0_5 = arith.constant 0 : index
    %c0_6 = arith.constant 0 : index
    %11 = vector.load %arg2[%c0_5, %c0_6] : memref<128x128xbf16, #tpu.memory_space<vmem>>, vector<128x128xbf16>
    %cst_7 = arith.constant dense<0.000000e+00> : vector<256x128xf32>
    %12 = tpu.matmul %10, %11, %cst_7 {dimension_numbers = #tpu.dot_dimension_numbers<[1], [0], [0], [1], [0, 0, 1, 1], [], []>} : vector<256x128xbf16>, vector<128x128xbf16>, vector<256x128xf32> -> vector<256x128xf32>
    %c0_8 = arith.constant 0 : index
    %c0_9 = arith.constant 0 : index
    %13 = vector.load %arg5[%c0_8, %c0_9] : memref<1x128xf32, #tpu.memory_space<vmem>>, vector<1x128xf32>
    %14 = vector.broadcast %13 : vector<1x128xf32> to vector<256x128xf32>
    %15 = arith.addf %12, %14 : vector<256x128xf32>
    %cst_10 = arith.constant 0.000000e+00 : f32
    %16 = vector.broadcast %cst_10 : f32 to vector<256x128xf32>
    %17 = arith.maximumf %15, %16 : vector<256x128xf32>
    %18 = arith.truncf %17 : vector<256x128xf32> to vector<256x128xbf16>
    %c0_11 = arith.constant 0 : index
    %c0_12 = arith.constant 0 : index
    %19 = vector.load %arg6[%c0_11, %c0_12] : memref<256x128xbf16, #tpu.memory_space<vmem>>, vector<256x128xbf16>
    tpu.vector_store %arg6[%c0_11, %c0_12], %18 {strides = array<i32>} : memref<256x128xbf16, #tpu.memory_space<vmem>>, vector<256x128xbf16>,
    return
  }
  func.func @transform_0(%arg0: i32) -> (i32, i32) {
    %c0_i32 = arith.constant 0 : i32
    %c0_i32_0 = arith.constant 0 : i32
    return %arg0, %c0_i32 : i32, i32
  }
  func.func @transform_1(%arg0: i32) -> (i32, i32) {
    %c0_i32 = arith.constant 0 : i32
    %c0_i32_0 = arith.constant 0 : i32
    %c0_i32_1 = arith.constant 0 : i32
    return %c0_i32, %c0_i32_0 : i32, i32
  }
  func.func @transform_2(%arg0: i32) -> (i32, i32) {
    %c0_i32 = arith.constant 0 : i32
    %c0_i32_0 = arith.constant 0 : i32
    %c0_i32_1 = arith.constant 0 : i32
    return %c0_i32, %c0_i32_0 : i32, i32
  }
  func.func @transform_3(%arg0: i32) -> (i32, i32) {
    %c0_i32 = arith.constant 0 : i32
    %c0_i32_0 = arith.constant 0 : i32
    %c0_i32_1 = arith.constant 0 : i32
    return %c0_i32, %c0_i32_0 : i32, i32
  }
  func.func @transform_4(%arg0: i32) -> (i32, i32) {
    %c0_i32 = arith.constant 0 : i32
    %c0_i32_0 = arith.constant 0 : i32
    %c0_i32_1 = arith.constant 0 : i32
    return %c0_i32, %c0_i32_0 : i32, i32
  }
  func.func @transform_5(%arg0: i32) -> (i32, i32) {
    %c0_i32 = arith.constant 0 : i32
    %c0_i32_0 = arith.constant 0 : i32
    return %arg0, %c0_i32 : i32, i32
  }
}

module attributes {stable_mosaic.version = 11 : i64} {
  func.func @_stage2_kernel(%arg0: i32, %arg1: memref<1x18x2x9x128xbf16, #tpu.memory_space<vmem>>, %arg2: memref<1x8x8x128xf32, #tpu.memory_space<vmem>>, %arg3: memref<9x128x128xbf16, #tpu.memory_space<vmem>>, %arg4: memref<1x128xf32, #tpu.memory_space<vmem>>, %arg5: memref<128x128xbf16, #tpu.memory_space<vmem>>, %arg6: memref<1x128xf32, #tpu.memory_space<vmem>>, %arg7: memref<1x8x8x128xf32, #tpu.memory_space<vmem>>) attributes {dimension_semantics = [#tpu.dimension_semantics<parallel>], iteration_bounds = array<i64: 2>, scalar_prefetch = 0 : i64, scratch_operands = 0 : i64, tpu.core_type = #tpu.core_type<tc>, window_params = [{transform_indices = @transform_0, window_bounds = array<i64: 1, 18, 2, 9, 128>}, {transform_indices = @transform_1, window_bounds = array<i64: 1, 8, 8, 128>}, {pipeline_mode = #tpu.pipeline_mode<synchronous>, transform_indices = @transform_2, window_bounds = array<i64: 9, 128, 128>}, {pipeline_mode = #tpu.pipeline_mode<synchronous>, transform_indices = @transform_3, window_bounds = array<i64: 1, 128>}, {pipeline_mode = #tpu.pipeline_mode<synchronous>, transform_indices = @transform_4, window_bounds = array<i64: 128, 128>}, {pipeline_mode = #tpu.pipeline_mode<synchronous>, transform_indices = @transform_5, window_bounds = array<i64: 1, 128>}, {transform_indices = @transform_6, window_bounds = array<i64: 1, 8, 8, 128>}]} {
    %c0_i32 = arith.constant 0 : i32
    %c8_i32 = arith.constant 8 : i32
    %0 = arith.addi %c0_i32, %c8_i32 : i32
    %c1_i32 = arith.constant 1 : i32
    scf.for %arg8 = %c0_i32 to %0 step %c1_i32  : i32 {
      %c1_i32_1 = arith.constant 1 : i32
      %1 = arith.muli %arg8, %c1_i32_1 : i32
      %c0_i32_2 = arith.constant 0 : i32
      %2 = arith.addi %c0_i32_2, %1 : i32
      %cst = arith.constant 0.000000e+00 : f32
      %3 = vector.broadcast %cst : f32 to vector<8x128xf32>
      %c2_i32 = arith.constant 2 : i32
      %4 = arith.muli %2, %c2_i32 : i32
      %c0_i32_3 = arith.constant 0 : i32
      %5 = arith.addi %4, %c0_i32_3 : i32
      %c0 = arith.constant 0 : index
      %6 = arith.index_cast %5 : i32 to index
      %c0_4 = arith.constant 0 : index
      %c0_5 = arith.constant 0 : index
      %c0_6 = arith.constant 0 : index
      %7 = vector.load %arg1[%c0, %6, %c0_4, %c0_5, %c0_6] : memref<1x18x2x9x128xbf16, #tpu.memory_space<vmem>>, vector<1x1x1x8x128xbf16>
      %8 = vector.shape_cast %7 : vector<1x1x1x8x128xbf16> to vector<8x128xbf16>
      %c0_7 = arith.constant 0 : index
      %c0_8 = arith.constant 0 : index
      %c0_9 = arith.constant 0 : index
      %9 = vector.load %arg3[%c0_7, %c0_8, %c0_9] : memref<9x128x128xbf16, #tpu.memory_space<vmem>>, vector<1x128x128xbf16>
      %10 = vector.shape_cast %9 : vector<1x128x128xbf16> to vector<128x128xbf16>
      %cst_10 = arith.constant dense<0.000000e+00> : vector<8x128xf32>
      %11 = tpu.matmul %8, %10, %cst_10 {dimension_numbers = #tpu.dot_dimension_numbers<[1], [0], [0], [1], [0, 0, 1, 1], [], []>} : vector<8x128xbf16>, vector<128x128xbf16>, vector<8x128xf32> -> vector<8x128xf32>
      %12 = arith.addf %3, %11 : vector<8x128xf32>
      %c0_11 = arith.constant 0 : index
      %13 = arith.index_cast %5 : i32 to index
      %c1 = arith.constant 1 : index
      %c0_12 = arith.constant 0 : index
      %c0_13 = arith.constant 0 : index
      %14 = vector.load %arg1[%c0_11, %13, %c1, %c0_12, %c0_13] : memref<1x18x2x9x128xbf16, #tpu.memory_space<vmem>>, vector<1x1x1x8x128xbf16>
      %15 = vector.shape_cast %14 : vector<1x1x1x8x128xbf16> to vector<8x128xbf16>
      %c1_14 = arith.constant 1 : index
      %c0_15 = arith.constant 0 : index
      %c0_16 = arith.constant 0 : index
      %16 = vector.load %arg3[%c1_14, %c0_15, %c0_16] : memref<9x128x128xbf16, #tpu.memory_space<vmem>>, vector<1x128x128xbf16>
      %17 = vector.shape_cast %16 : vector<1x128x128xbf16> to vector<128x128xbf16>
      %cst_17 = arith.constant dense<0.000000e+00> : vector<8x128xf32>
      %18 = tpu.matmul %15, %17, %cst_17 {dimension_numbers = #tpu.dot_dimension_numbers<[1], [0], [0], [1], [0, 0, 1, 1], [], []>} : vector<8x128xbf16>, vector<128x128xbf16>, vector<8x128xf32> -> vector<8x128xf32>
      %19 = arith.addf %12, %18 : vector<8x128xf32>
      %c0_18 = arith.constant 0 : index
      %20 = arith.index_cast %5 : i32 to index
      %c0_19 = arith.constant 0 : index
      %c1_20 = arith.constant 1 : index
      %c0_21 = arith.constant 0 : index
      %21 = vector.load %arg1[%c0_18, %20, %c0_19, %c1_20, %c0_21] : memref<1x18x2x9x128xbf16, #tpu.memory_space<vmem>>, vector<1x1x1x8x128xbf16>
      %22 = vector.shape_cast %21 : vector<1x1x1x8x128xbf16> to vector<8x128xbf16>
      %c2 = arith.constant 2 : index
      %c0_22 = arith.constant 0 : index
      %c0_23 = arith.constant 0 : index
      %23 = vector.load %arg3[%c2, %c0_22, %c0_23] : memref<9x128x128xbf16, #tpu.memory_space<vmem>>, vector<1x128x128xbf16>
      %24 = vector.shape_cast %23 : vector<1x128x128xbf16> to vector<128x128xbf16>
      %cst_24 = arith.constant dense<0.000000e+00> : vector<8x128xf32>
      %25 = tpu.matmul %22, %24, %cst_24 {dimension_numbers = #tpu.dot_dimension_numbers<[1], [0], [0], [1], [0, 0, 1, 1], [], []>} : vector<8x128xbf16>, vector<128x128xbf16>, vector<8x128xf32> -> vector<8x128xf32>
      %26 = arith.addf %19, %25 : vector<8x128xf32>
      %c2_i32_25 = arith.constant 2 : i32
      %27 = arith.muli %2, %c2_i32_25 : i32
      %c1_i32_26 = arith.constant 1 : i32
      %28 = arith.addi %27, %c1_i32_26 : i32
      %c0_27 = arith.constant 0 : index
      %29 = arith.index_cast %28 : i32 to index
      %c0_28 = arith.constant 0 : index
      %c0_29 = arith.constant 0 : index
      %c0_30 = arith.constant 0 : index
      %30 = vector.load %arg1[%c0_27, %29, %c0_28, %c0_29, %c0_30] : memref<1x18x2x9x128xbf16, #tpu.memory_space<vmem>>, vector<1x1x1x8x128xbf16>
      %31 = vector.shape_cast %30 : vector<1x1x1x8x128xbf16> to vector<8x128xbf16>
      %c3 = arith.constant 3 : index
      %c0_31 = arith.constant 0 : index
      %c0_32 = arith.constant 0 : index
      %32 = vector.load %arg3[%c3, %c0_31, %c0_32] : memref<9x128x128xbf16, #tpu.memory_space<vmem>>, vector<1x128x128xbf16>
      %33 = vector.shape_cast %32 : vector<1x128x128xbf16> to vector<128x128xbf16>
      %cst_33 = arith.constant dense<0.000000e+00> : vector<8x128xf32>
      %34 = tpu.matmul %31, %33, %cst_33 {dimension_numbers = #tpu.dot_dimension_numbers<[1], [0], [0], [1], [0, 0, 1, 1], [], []>} : vector<8x128xbf16>, vector<128x128xbf16>, vector<8x128xf32> -> vector<8x128xf32>
      %35 = arith.addf %26, %34 : vector<8x128xf32>
      %c0_34 = arith.constant 0 : index
      %36 = arith.index_cast %28 : i32 to index
      %c1_35 = arith.constant 1 : index
      %c0_36 = arith.constant 0 : index
      %c0_37 = arith.constant 0 : index
      %37 = vector.load %arg1[%c0_34, %36, %c1_35, %c0_36, %c0_37] : memref<1x18x2x9x128xbf16, #tpu.memory_space<vmem>>, vector<1x1x1x8x128xbf16>
      %38 = vector.shape_cast %37 : vector<1x1x1x8x128xbf16> to vector<8x128xbf16>
      %c4 = arith.constant 4 : index
      %c0_38 = arith.constant 0 : index
      %c0_39 = arith.constant 0 : index
      %39 = vector.load %arg3[%c4, %c0_38, %c0_39] : memref<9x128x128xbf16, #tpu.memory_space<vmem>>, vector<1x128x128xbf16>
      %40 = vector.shape_cast %39 : vector<1x128x128xbf16> to vector<128x128xbf16>
      %cst_40 = arith.constant dense<0.000000e+00> : vector<8x128xf32>
      %41 = tpu.matmul %38, %40, %cst_40 {dimension_numbers = #tpu.dot_dimension_numbers<[1], [0], [0], [1], [0, 0, 1, 1], [], []>} : vector<8x128xbf16>, vector<128x128xbf16>, vector<8x128xf32> -> vector<8x128xf32>
      %42 = arith.addf %35, %41 : vector<8x128xf32>
      %c0_41 = arith.constant 0 : index
      %43 = arith.index_cast %28 : i32 to index
      %c0_42 = arith.constant 0 : index
      %c1_43 = arith.constant 1 : index
      %c0_44 = arith.constant 0 : index
      %44 = vector.load %arg1[%c0_41, %43, %c0_42, %c1_43, %c0_44] : memref<1x18x2x9x128xbf16, #tpu.memory_space<vmem>>, vector<1x1x1x8x128xbf16>
      %45 = vector.shape_cast %44 : vector<1x1x1x8x128xbf16> to vector<8x128xbf16>
      %c5 = arith.constant 5 : index
      %c0_45 = arith.constant 0 : index
      %c0_46 = arith.constant 0 : index
      %46 = vector.load %arg3[%c5, %c0_45, %c0_46] : memref<9x128x128xbf16, #tpu.memory_space<vmem>>, vector<1x128x128xbf16>
      %47 = vector.shape_cast %46 : vector<1x128x128xbf16> to vector<128x128xbf16>
      %cst_47 = arith.constant dense<0.000000e+00> : vector<8x128xf32>
      %48 = tpu.matmul %45, %47, %cst_47 {dimension_numbers = #tpu.dot_dimension_numbers<[1], [0], [0], [1], [0, 0, 1, 1], [], []>} : vector<8x128xbf16>, vector<128x128xbf16>, vector<8x128xf32> -> vector<8x128xf32>
      %49 = arith.addf %42, %48 : vector<8x128xf32>
      %c2_i32_48 = arith.constant 2 : i32
      %50 = arith.muli %2, %c2_i32_48 : i32
      %c2_i32_49 = arith.constant 2 : i32
      %51 = arith.addi %50, %c2_i32_49 : i32
      %c0_50 = arith.constant 0 : index
      %52 = arith.index_cast %51 : i32 to index
      %c0_51 = arith.constant 0 : index
      %c0_52 = arith.constant 0 : index
      %c0_53 = arith.constant 0 : index
      %53 = vector.load %arg1[%c0_50, %52, %c0_51, %c0_52, %c0_53] : memref<1x18x2x9x128xbf16, #tpu.memory_space<vmem>>, vector<1x1x1x8x128xbf16>
      %54 = vector.shape_cast %53 : vector<1x1x1x8x128xbf16> to vector<8x128xbf16>
      %c6 = arith.constant 6 : index
      %c0_54 = arith.constant 0 : index
      %c0_55 = arith.constant 0 : index
      %55 = vector.load %arg3[%c6, %c0_54, %c0_55] : memref<9x128x128xbf16, #tpu.memory_space<vmem>>, vector<1x128x128xbf16>
      %56 = vector.shape_cast %55 : vector<1x128x128xbf16> to vector<128x128xbf16>
      %cst_56 = arith.constant dense<0.000000e+00> : vector<8x128xf32>
      %57 = tpu.matmul %54, %56, %cst_56 {dimension_numbers = #tpu.dot_dimension_numbers<[1], [0], [0], [1], [0, 0, 1, 1], [], []>} : vector<8x128xbf16>, vector<128x128xbf16>, vector<8x128xf32> -> vector<8x128xf32>
      %58 = arith.addf %49, %57 : vector<8x128xf32>
      %c0_57 = arith.constant 0 : index
      %59 = arith.index_cast %51 : i32 to index
      %c1_58 = arith.constant 1 : index
      %c0_59 = arith.constant 0 : index
      %c0_60 = arith.constant 0 : index
      %60 = vector.load %arg1[%c0_57, %59, %c1_58, %c0_59, %c0_60] : memref<1x18x2x9x128xbf16, #tpu.memory_space<vmem>>, vector<1x1x1x8x128xbf16>
      %61 = vector.shape_cast %60 : vector<1x1x1x8x128xbf16> to vector<8x128xbf16>
      %c7 = arith.constant 7 : index
      %c0_61 = arith.constant 0 : index
      %c0_62 = arith.constant 0 : index
      %62 = vector.load %arg3[%c7, %c0_61, %c0_62] : memref<9x128x128xbf16, #tpu.memory_space<vmem>>, vector<1x128x128xbf16>
      %63 = vector.shape_cast %62 : vector<1x128x128xbf16> to vector<128x128xbf16>
      %cst_63 = arith.constant dense<0.000000e+00> : vector<8x128xf32>
      %64 = tpu.matmul %61, %63, %cst_63 {dimension_numbers = #tpu.dot_dimension_numbers<[1], [0], [0], [1], [0, 0, 1, 1], [], []>} : vector<8x128xbf16>, vector<128x128xbf16>, vector<8x128xf32> -> vector<8x128xf32>
      %65 = arith.addf %58, %64 : vector<8x128xf32>
      %c0_64 = arith.constant 0 : index
      %66 = arith.index_cast %51 : i32 to index
      %c0_65 = arith.constant 0 : index
      %c1_66 = arith.constant 1 : index
      %c0_67 = arith.constant 0 : index
      %67 = vector.load %arg1[%c0_64, %66, %c0_65, %c1_66, %c0_67] : memref<1x18x2x9x128xbf16, #tpu.memory_space<vmem>>, vector<1x1x1x8x128xbf16>
      %68 = vector.shape_cast %67 : vector<1x1x1x8x128xbf16> to vector<8x128xbf16>
      %c8 = arith.constant 8 : index
      %c0_68 = arith.constant 0 : index
      %c0_69 = arith.constant 0 : index
      %69 = vector.load %arg3[%c8, %c0_68, %c0_69] : memref<9x128x128xbf16, #tpu.memory_space<vmem>>, vector<1x128x128xbf16>
      %70 = vector.shape_cast %69 : vector<1x128x128xbf16> to vector<128x128xbf16>
      %cst_70 = arith.constant dense<0.000000e+00> : vector<8x128xf32>
      %71 = tpu.matmul %68, %70, %cst_70 {dimension_numbers = #tpu.dot_dimension_numbers<[1], [0], [0], [1], [0, 0, 1, 1], [], []>} : vector<8x128xbf16>, vector<128x128xbf16>, vector<8x128xf32> -> vector<8x128xf32>
      %72 = arith.addf %65, %71 : vector<8x128xf32>
      %c0_71 = arith.constant 0 : index
      %c0_72 = arith.constant 0 : index
      %73 = vector.load %arg4[%c0_71, %c0_72] : memref<1x128xf32, #tpu.memory_space<vmem>>, vector<1x128xf32>
      %74 = vector.broadcast %73 : vector<1x128xf32> to vector<8x128xf32>
      %75 = arith.addf %72, %74 : vector<8x128xf32>
      %cst_73 = arith.constant 0.000000e+00 : f32
      %76 = vector.broadcast %cst_73 : f32 to vector<8x128xf32>
      %77 = arith.maximumf %75, %76 : vector<8x128xf32>
      %78 = arith.truncf %77 : vector<8x128xf32> to vector<8x128xbf16>
      %c0_74 = arith.constant 0 : index
      %c0_75 = arith.constant 0 : index
      %79 = vector.load %arg5[%c0_74, %c0_75] : memref<128x128xbf16, #tpu.memory_space<vmem>>, vector<128x128xbf16>
      %cst_76 = arith.constant dense<0.000000e+00> : vector<8x128xf32>
      %80 = tpu.matmul %78, %79, %cst_76 {dimension_numbers = #tpu.dot_dimension_numbers<[1], [0], [0], [1], [0, 0, 1, 1], [], []>} : vector<8x128xbf16>, vector<128x128xbf16>, vector<8x128xf32> -> vector<8x128xf32>
      %c0_77 = arith.constant 0 : index
      %c0_78 = arith.constant 0 : index
      %81 = vector.load %arg6[%c0_77, %c0_78] : memref<1x128xf32, #tpu.memory_space<vmem>>, vector<1x128xf32>
      %82 = vector.broadcast %81 : vector<1x128xf32> to vector<8x128xf32>
      %83 = arith.addf %80, %82 : vector<8x128xf32>
      %c0_79 = arith.constant 0 : index
      %84 = arith.index_cast %2 : i32 to index
      %c0_80 = arith.constant 0 : index
      %c0_81 = arith.constant 0 : index
      %85 = vector.load %arg2[%c0_79, %84, %c0_80, %c0_81] : memref<1x8x8x128xf32, #tpu.memory_space<vmem>>, vector<1x1x8x128xf32>
      %86 = vector.shape_cast %85 : vector<1x1x8x128xf32> to vector<8x128xf32>
      %87 = arith.addf %83, %86 : vector<8x128xf32>
      %c0_82 = arith.constant 0 : index
      %88 = arith.index_cast %2 : i32 to index
      %c0_83 = arith.constant 0 : index
      %c0_84 = arith.constant 0 : index
      %89 = vector.load %arg7[%c0_82, %88, %c0_83, %c0_84] : memref<1x8x8x128xf32, #tpu.memory_space<vmem>>, vector<1x1x8x128xf32>
      %90 = vector.shape_cast %89 : vector<1x1x8x128xf32> to vector<8x128xf32>
      %91 = vector.shape_cast %87 : vector<8x128xf32> to vector<1x1x8x128xf32>
      tpu.vector_store %arg7[%c0_82, %88, %c0_83, %c0_84], %91 {strides = array<i32>} : memref<1x8x8x128xf32, #tpu.memory_space<vmem>>, vector<1x1x8x128xf32>,
    }
    %c8_i32_0 = arith.constant 8 : i32
    return
  }
  func.func @transform_0(%arg0: i32) -> (i32, i32, i32, i32, i32) {
    %c0_i32 = arith.constant 0 : i32
    %c0_i32_0 = arith.constant 0 : i32
    %c0_i32_1 = arith.constant 0 : i32
    %c0_i32_2 = arith.constant 0 : i32
    %c0_i32_3 = arith.constant 0 : i32
    return %arg0, %c0_i32, %c0_i32_0, %c0_i32_1, %c0_i32_2 : i32, i32, i32, i32, i32
  }
  func.func @transform_1(%arg0: i32) -> (i32, i32, i32, i32) {
    %c0_i32 = arith.constant 0 : i32
    %c0_i32_0 = arith.constant 0 : i32
    %c0_i32_1 = arith.constant 0 : i32
    %c0_i32_2 = arith.constant 0 : i32
    return %arg0, %c0_i32, %c0_i32_0, %c0_i32_1 : i32, i32, i32, i32
  }
  func.func @transform_2(%arg0: i32) -> (i32, i32, i32) {
    %c0_i32 = arith.constant 0 : i32
    %c0_i32_0 = arith.constant 0 : i32
    %c0_i32_1 = arith.constant 0 : i32
    %c0_i32_2 = arith.constant 0 : i32
    return %c0_i32, %c0_i32_0, %c0_i32_1 : i32, i32, i32
  }
  func.func @transform_3(%arg0: i32) -> (i32, i32) {
    %c0_i32 = arith.constant 0 : i32
    %c0_i32_0 = arith.constant 0 : i32
    %c0_i32_1 = arith.constant 0 : i32
    return %c0_i32, %c0_i32_0 : i32, i32
  }
  func.func @transform_4(%arg0: i32) -> (i32, i32) {
    %c0_i32 = arith.constant 0 : i32
    %c0_i32_0 = arith.constant 0 : i32
    %c0_i32_1 = arith.constant 0 : i32
    return %c0_i32, %c0_i32_0 : i32, i32
  }
  func.func @transform_5(%arg0: i32) -> (i32, i32) {
    %c0_i32 = arith.constant 0 : i32
    %c0_i32_0 = arith.constant 0 : i32
    %c0_i32_1 = arith.constant 0 : i32
    return %c0_i32, %c0_i32_0 : i32, i32
  }
  func.func @transform_6(%arg0: i32) -> (i32, i32, i32, i32) {
    %c0_i32 = arith.constant 0 : i32
    %c0_i32_0 = arith.constant 0 : i32
    %c0_i32_1 = arith.constant 0 : i32
    %c0_i32_2 = arith.constant 0 : i32
    return %arg0, %c0_i32, %c0_i32_0, %c0_i32_1 : i32, i32, i32, i32
  }
}

</mosaic_0001>

<bundles_post_ra>
// kernel: bottleneck_v2_forward.2
= control target key start
LH: loop header
LB: loop body
LE: loop exit
PB: predicated region body
PF: predicated region fallthrough
CT: control target
= control target key end

     0   :  { %s1301_s18 = smov 0   ;;  %s1496_s0 = inlined_call_operand.vmem [shape: bf16[512,128], index: 0, kind: input, shape index: {}]   ;;  %s1497_s1 = inlined_call_operand.vmem [shape: bf16[128,128], index: 1, kind: input, shape index: {}]   ;;  %s1498_s2 = inlined_call_operand.vmem [shape: f32[1,128], index: 2, kind: input, shape index: {}]   ;;  %s1499_s3 = inlined_call_operand.vmem [shape: f32[1,128], index: 3, kind: input, shape index: {}]   ;;  %s1500_s4 = inlined_call_operand.vmem [shape: f32[1,128], index: 4, kind: input, shape index: {}]   ;;  %s1501_s5 = inlined_call_operand.vmem [shape: bf16[512,128], index: 5, kind: output, shape index: {}]  }
   0x1 LB: > { %s899_s19 = sadd.s32 4294967295, %s1269_s18   ;;  %p903_p0 = scmp.ge.s32.totalorder %s1269_s18, 1  ;;  %s1269_s18 = sphi %s1301_s18, %s15_s18  }
   0x2   : > { %p188_p1 = scmp.lt.s32.totalorder %s1269_s18, 3 }
   0x4   : > { %p189_p2 = pnand %p903_p0, %p188_p1 }
   0x5   : > { %v1255_v0 = vld [vmem:[%s1497_s1] sm:$0xff] (!%p189_p2)   ;;  %s904_s22 = sshll.u32 (!%p189_p2), %s899_s19, 5  ;;  %v1256_v1 = vld [vmem:[%s1497_s1 + $0x8] sm:$0xff] (!%p189_p2)   ;;  %v1257_v2 = vld [vmem:[%s1497_s1 + $0x10] sm:$0xff] (!%p189_p2)  }
   0x6   : > { %192 = sbr.rel (%p189_p2) target bundleno = 285 (0x11d), region = 40  ;;  %p217_p3 = scmp.lt.s32.totalorder (!%p189_p2), %s904_s22, 63  ;;  %1183 = vmatprep.subr.bf16.mxu0 (!%p189_p2), %v1255_v0  ;;  %1231 = vmatprep.subr.bf16.mxu1 (!%p189_p2), %v1255_v0  ;;  %v1258_v3 = vld [vmem:[%s1497_s1 + $0x18] sm:$0xff] (!%p189_p2)   ;;  %v1335_v5 = vld [vmem:[%s1498_s2] ss:$0 sm:$0xff] (!%p189_p2)  ;;  %v1260_v37 = vld [vmem:[%s1497_s1 + $0x28] sm:$0xff] (!%p189_p2)  }
   0x7   : > { %1184 = vmatpush3.bf16.msra.mxu0 (!%p189_p2), %v1255_v0  ;;  %1239 = vmatpush3.bf16.msra.mxu1 (!%p189_p2), %v1255_v0  ;;  %v1343_v11 = vld [vmem:[%s1499_s3] ss:$0 sm:$0xff] (!%p189_p2)  ;;  %v1261_v54 = vld [vmem:[%s1497_s1 + $0x30] sm:$0xff] (!%p189_p2)  }
   0x8   : > { %1185 = vmatprep.subr.bf16.mxu0 (!%p189_p2), %v1256_v1  ;;  %1232 = vmatprep.subr.bf16.mxu1 (!%p189_p2), %v1256_v1  ;;  %v1259_v21 = vld [vmem:[%s1497_s1 + $0x20] sm:$0xff] (!%p189_p2)  }
   0xb   : > { %1186 = vmatpush3.bf16.msra.mxu0 (!%p189_p2), %v1256_v1  ;;  %1240 = vmatpush3.bf16.msra.mxu1 (!%p189_p2), %v1256_v1 }
   0xc   : > { %1187 = vmatprep.subr.bf16.mxu0 (!%p189_p2), %v1257_v2  ;;  %1233 = vmatprep.subr.bf16.mxu1 (!%p189_p2), %v1257_v2 }
   0xd   : > { %s1503_s22 = smov (!%p217_p3, %s904_s22), 63 }
   0xe   : > { %s905_s27 = sshll.u32 %s1503_s22, 2 }
   0xf   : > { %s1326_s30 = scalar_lea.vmem %s1496_s0, %s905_s27  ;;  %1188 = vmatpush3.bf16.msra.mxu0 %v1257_v2  ;;  %1241 = vmatpush3.bf16.msra.mxu1 %v1257_v2  ;;  %s1451_s26 = scalar_lea.vmem %s1501_s5, %s905_s27 }
  0x10   : > { %v986_v4 = vld [vmem:[%s1326_s30] sm:$0xff]   ;;  %v1129_v9 = vld [vmem:[%s1326_s30 + $0x8] sm:$0xff]   ;;  %v1130_v20 = vld [vmem:[%s1326_s30 + $0x10] sm:$0xff]   ;;  %1189 = vmatprep.subr.bf16.mxu0 %v1258_v3  ;;  %1234 = vmatprep.subr.bf16.mxu1 %v1258_v3 }
  0x11   : > { %v987_v6 = vunpack.c.l.bf16 %v986_v4  ;;  %v988_v7 = vunpack.c.h.bf16 %v986_v4  ;;  %v1136_v8 = vld [vmem:[%s1326_s30 + $0x40] sm:$0xff]   ;;  %v1137_v10 = vld [vmem:[%s1326_s30 + $0x48] sm:$0xff]   ;;  %v991_v14 = vunpack.c.l.bf16 %v1129_v9  ;;  %v992_v15 = vunpack.c.h.bf16 %v1129_v9  ;;  %v1138_v36 = vld [vmem:[%s1326_s30 + $0x50] sm:$0xff]  }
  0x12   : > { %v1019_v12 = vunpack.c.l.bf16 %v1136_v8  ;;  %v1020_v13 = vunpack.c.h.bf16 %v1136_v8  ;;  %v1023_v18 = vunpack.c.l.bf16 %v1137_v10  ;;  %v1024_v19 = vunpack.c.h.bf16 %v1137_v10  ;;  %v1131_v41 = vld [vmem:[%s1326_s30 + $0x18] sm:$0xff]   ;;  %v1132_v63 = vld [vmem:[%s1326_s30 + $0x20] sm:$0xff]  }
  0x13   : > { %v300_v16 = vmul.f32 %v987_v6, %v1335_v5  ;;  %v301_v17 = vmul.f32 %v988_v7, %v1335_v5  ;;  %v302_v24 = vmul.f32 %v991_v14, %v1335_v5  ;;  %v303_v27 = vmul.f32 %v992_v15, %v1335_v5  ;;  %1190 = vmatpush3.bf16.msra.mxu0 %v1258_v3  ;;  %v1139_v49 = vld [vmem:[%s1326_s30 + $0x58] sm:$0xff]   ;;  %v1140_v15 = vld [vmem:[%s1326_s30 + $0x60] sm:$0xff]  }
  0x14   : > { %v316_v22 = vmul.f32 %v1019_v12, %v1335_v5  ;;  %v317_v23 = vmul.f32 %v1020_v13, %v1335_v5  ;;  %v318_v28 = vmul.f32 %v1023_v18, %v1335_v5  ;;  %v995_v32 = vunpack.c.l.bf16 %v1130_v20  ;;  %1242 = vmatpush3.bf16.msra.mxu1 %v1258_v3  ;;  %1191 = vmatprep.subr.bf16.mxu0 %v1259_v21  ;;  %v1262_v9 = vld [vmem:[%s1497_s1 + $0x38] sm:$0xff]  }
  0x15   : > { %v339_v25 = vadd.f32 %v1343_v11, %v300_v16  ;;  %v340_v26 = vadd.f32 %v1343_v11, %v301_v17  ;;  %v341_v31 = vadd.f32 %v1343_v11, %v302_v24  ;;  %v319_v35 = vmul.f32 %v1024_v19, %v1335_v5  ;;  %1235 = vmatprep.subr.bf16.mxu1 %v1259_v21 }
  0x16   : > { %v355_v29 = vadd.f32 %v1343_v11, %v316_v22  ;;  %v356_v30 = vadd.f32 %v1343_v11, %v317_v23  ;;  %v342_v40 = vadd.f32 %v1343_v11, %v303_v27  ;;  %v357_v43 = vadd.f32 %v1343_v11, %v318_v28  ;;  %v1133_v22 = vld [vmem:[%s1326_s30 + $0x28] sm:$0xff]  }
  0x17   : > { %v371_v33 = vmax.f32 %v339_v25, 0.0  ;;  %v372_v34 = vmax.f32 %v340_v26, 0.0  ;;  %v996_v44 = vunpack.c.h.bf16 %v1130_v20  ;;  %v373_v46 = vmax.f32 %v341_v31, 0.0  ;;  %1192 = vmatpush3.bf16.msra.mxu0 %v1259_v21  ;;  %v1141_v27 = vld [vmem:[%s1326_s30 + $0x68] sm:$0xff]  }
  0x18   : > { %v387_v38 = vmax.f32 %v355_v29, 0.0  ;;  %v388_v39 = vmax.f32 %v356_v30, 0.0  ;;  %v304_v47 = vmul.f32 %v995_v32, %v1335_v5  ;;  %v1027_v48 = vunpack.c.l.bf16 %v1138_v36  ;;  %1243 = vmatpush3.bf16.msra.mxu1 %v1259_v21  ;;  %1193 = vmatprep.subr.bf16.mxu0 %v1260_v37 }
  0x19   : > { %v403_v42 = vpack.c.bf16 %v372_v34, %v371_v33  ;;  %v358_v50 = vadd.f32 %v1343_v11, %v319_v35  ;;  %v305_v51 = vmul.f32 %v996_v44, %v1335_v5  ;;  %v1028_v52 = vunpack.c.h.bf16 %v1138_v36  ;;  %1236 = vmatprep.subr.bf16.mxu1 %v1260_v37  ;;  %v1134_v36 = vld [vmem:[%s1326_s30 + $0x30] sm:$0xff]  }
  0x1a   : > { %v411_v45 = vpack.c.bf16 %v388_v39, %v387_v38  ;;  %v999_v53 = vunpack.c.l.bf16 %v1131_v41  ;;  %v374_v55 = vmax.f32 %v342_v40, 0.0  ;;  %v343_v56 = vadd.f32 %v1343_v11, %v304_v47 }
  0x1b   : > { %v320_v57 = vmul.f32 %v1027_v48, %v1335_v5  ;;  %v1000_v58 = vunpack.c.h.bf16 %v1131_v41  ;;  %1199 = vmatprep.mubr.bf16.mxu0 %v403_v42  ;;  %v344_v59 = vadd.f32 %v1343_v11, %v305_v51  ;;  %v321_v60 = vmul.f32 %v1028_v52, %v1335_v5  ;;  %1194 = vmatpush3.bf16.msra.mxu0 %v1260_v37  ;;  %v1142_v52 = vld [vmem:[%s1326_s30 + $0x70] sm:$0xff]  }
  0x1c   : > { %1215 = vmatprep.mubr.bf16.mxu1 %v411_v45  ;;  %v306_v61 = vmul.f32 %v999_v53, %v1335_v5  ;;  %v1031_v62 = vunpack.c.l.bf16 %v1139_v49  ;;  %v389_v0 = vmax.f32 %v357_v43, 0.0  ;;  %v1032_v3 = vunpack.c.h.bf16 %v1139_v49  ;;  %1244 = vmatpush3.bf16.msra.mxu1 %v1260_v37 }
  0x1d   : > { %v359_v1 = vadd.f32 %v1343_v11, %v320_v57  ;;  %v307_v2 = vmul.f32 %v1000_v58, %v1335_v5  ;;  %v390_v4 = vmax.f32 %v358_v50, 0.0  ;;  %v375_v6 = vmax.f32 %v343_v56, 0.0  ;;  %1195 = vmatprep.subr.bf16.mxu0 %v1261_v54  ;;  %1237 = vmatprep.subr.bf16.mxu1 %v1261_v54 }
  0x1e   : > { %v376_v7 = vmax.f32 %v344_v59, 0.0  ;;  %v360_v8 = vadd.f32 %v1343_v11, %v321_v60  ;;  %v345_v10 = vadd.f32 %v1343_v11, %v306_v61  ;;  %v322_v12 = vmul.f32 %v1031_v62, %v1335_v5  ;;  %v1135_v60 = vld [vmem:[%s1326_s30 + $0x38] sm:$0xff]  }
  0x1f   : > { %v323_v13 = vmul.f32 %v1032_v3, %v1335_v5  ;;  %v1003_v14 = vunpack.c.l.bf16 %v1132_v63  ;;  %v404_v16 = vpack.c.bf16 %v374_v55, %v373_v46  ;;  %v391_v17 = vmax.f32 %v359_v1, 0.0  ;;  %1196 = vmatpush3.bf16.msra.mxu0 %v1261_v54 }
  0x20   : > { %v392_v18 = vmax.f32 %v360_v8, 0.0  ;;  %v346_v19 = vadd.f32 %v1343_v11, %v307_v2  ;;  %v1004_v20 = vunpack.c.h.bf16 %v1132_v63  ;;  %1245 = vmatpush3.bf16.msra.mxu1 %v1261_v54  ;;  %v412_v23 = vpack.c.bf16 %v390_v4, %v389_v0  ;;  %1197 = vmatprep.subr.bf16.mxu0 %v1262_v9 }
  0x21   : > { %v308_v21 = vmul.f32 %v1003_v14, %v1335_v5  ;;  %v405_v24 = vpack.c.bf16 %v376_v7, %v375_v6  ;;  %v1035_v25 = vunpack.c.l.bf16 %v1140_v15  ;;  %v1036_v26 = vunpack.c.h.bf16 %v1140_v15  ;;  %1238 = vmatprep.subr.bf16.mxu1 %v1262_v9  ;;  %v1143_v6 = vld [vmem:[%s1326_s30 + $0x78] sm:$0xff]  }
  0x22   : > { %v377_v28 = vmax.f32 %v345_v10, 0.0  ;;  %v361_v29 = vadd.f32 %v1343_v11, %v322_v12  ;;  %v362_v30 = vadd.f32 %v1343_v11, %v323_v13  ;;  %v309_v31 = vmul.f32 %v1004_v20, %v1335_v5 }
  0x23   : > { %v324_v32 = vmul.f32 %v1035_v25, %v1335_v5  ;;  %v325_v33 = vmul.f32 %v1036_v26, %v1335_v5  ;;  %v1007_v34 = vunpack.c.l.bf16 %v1133_v22  ;;  %v1008_v35 = vunpack.c.h.bf16 %v1133_v22  ;;  %1198 = vmatpush3.bf16.msra.mxu0 %v1262_v9 }
  0x24   : > { %v413_v37 = vpack.c.bf16 %v392_v18, %v391_v17  ;;  %v378_v38 = vmax.f32 %v346_v19, 0.0  ;;  %v347_v39 = vadd.f32 %v1343_v11, %v308_v21  ;;  %v1039_v40 = vunpack.c.l.bf16 %v1141_v27  ;;  %1246 = vmatpush3.bf16.msra.mxu1 %v1262_v9 }
  0x25   : > { %v348_v41 = vadd.f32 %v1343_v11, %v309_v31  ;;  %v363_v42 = vadd.f32 %v1343_v11, %v324_v32  ;;  %v364_v43 = vadd.f32 %v1343_v11, %v325_v33  ;;  %v1040_v44 = vunpack.c.h.bf16 %v1141_v27 }
  0x26   : > { %v310_v45 = vmul.f32 %v1007_v34, %v1335_v5  ;;  %v311_v46 = vmul.f32 %v1008_v35, %v1335_v5  ;;  %v1011_v47 = vunpack.c.l.bf16 %v1134_v36  ;;  %v393_v48 = vmax.f32 %v361_v29, 0.0  ;;  %1200 = vmatmul.mubr.bf16.vlgmr.msra.gmra.mrb[0].mxu0 %v404_v16 }
  0x27   : > { %v394_v49 = vmax.f32 %v362_v30, 0.0  ;;  %v326_v50 = vmul.f32 %v1039_v40, %v1335_v5  ;;  %v327_v51 = vmul.f32 %v1040_v44, %v1335_v5  ;;  %1216 = vmatmul.mubr.bf16.vlgmr.msra.gmra.mrb[0].mxu1 %v412_v23  ;;  %v406_v53 = vpack.c.bf16 %v378_v38, %v377_v28  ;;  %1203 = vmatprep.mubr.bf16.mxu0 %v405_v24 }
  0x28   : > { %v379_v54 = vmax.f32 %v347_v39, 0.0  ;;  %v1012_v55 = vunpack.c.h.bf16 %v1134_v36  ;;  %1219 = vmatprep.mubr.bf16.mxu1 %v413_v37  ;;  %v380_v56 = vmax.f32 %v348_v41, 0.0  ;;  %v395_v57 = vmax.f32 %v363_v42, 0.0 }
  0x29   : > { %v396_v58 = vmax.f32 %v364_v43, 0.0  ;;  %v312_v59 = vmul.f32 %v1011_v47, %v1335_v5  ;;  %v349_v61 = vadd.f32 %v1343_v11, %v310_v45  ;;  %v350_v62 = vadd.f32 %v1343_v11, %v311_v46  ;;  %v1436_v45 = vld [vmem:[%s1500_s4] ss:$0 sm:$0xff] }
  0x2a   : > { %v313_v63 = vmul.f32 %v1012_v55, %v1335_v5  ;;  %v1043_v0 = vunpack.c.l.bf16 %v1142_v52  ;;  %v414_v1 = vpack.c.bf16 %v394_v49, %v393_v48  ;;  %v365_v2 = vadd.f32 %v1343_v11, %v326_v50 }
  0x2b   : > { %v366_v3 = vadd.f32 %v1343_v11, %v327_v51  ;;  %v1044_v4 = vunpack.c.h.bf16 %v1142_v52  ;;  %v351_v7 = vadd.f32 %v1343_v11, %v312_v59  ;;  %v1015_v9 = vunpack.c.l.bf16 %v1135_v60 }
  0x2c   : > { %v328_v8 = vmul.f32 %v1043_v0, %v1335_v5  ;;  %v1016_v10 = vunpack.c.h.bf16 %v1135_v60  ;;  %v407_v12 = vpack.c.bf16 %v380_v56, %v379_v54  ;;  %v415_v13 = vpack.c.bf16 %v396_v58, %v395_v57 }
  0x2d   : > { %v352_v14 = vadd.f32 %v1343_v11, %v313_v63  ;;  %v329_v15 = vmul.f32 %v1044_v4, %v1335_v5  ;;  %v381_v16 = vmax.f32 %v349_v61, 0.0  ;;  %v382_v17 = vmax.f32 %v350_v62, 0.0 }
  0x2e   : > { %v367_v18 = vadd.f32 %v1343_v11, %v328_v8  ;;  %v1047_v19 = vunpack.c.l.bf16 %v1143_v6  ;;  %v397_v20 = vmax.f32 %v365_v2, 0.0  ;;  %v398_v21 = vmax.f32 %v366_v3, 0.0  ;;  %1204 = vmatmul.mubr.bf16.gmra.mrb[4].mxu0 %v406_v53 }
  0x2f   : > { %v368_v22 = vadd.f32 %v1343_v11, %v329_v15  ;;  %v1048_v23 = vunpack.c.h.bf16 %v1143_v6  ;;  %1220 = vmatmul.mubr.bf16.gmra.mrb[4].mxu1 %v414_v1  ;;  %v383_v24 = vmax.f32 %v351_v7, 0.0  ;;  %v314_v25 = vmul.f32 %v1015_v9, %v1335_v5  ;;  %1207 = vmatprep.mubr.bf16.mxu0 %v407_v12 }
  0x30   : > { %v315_v26 = vmul.f32 %v1016_v10, %v1335_v5  ;;  %v330_v27 = vmul.f32 %v1047_v19, %v1335_v5  ;;  %1223 = vmatprep.mubr.bf16.mxu1 %v415_v13  ;;  %v384_v28 = vmax.f32 %v352_v14, 0.0  ;;  %v399_v29 = vmax.f32 %v367_v18, 0.0 }
  0x31   : > { %v400_v30 = vmax.f32 %v368_v22, 0.0  ;;  %v331_v31 = vmul.f32 %v1048_v23, %v1335_v5  ;;  %v408_v32 = vpack.c.bf16 %v382_v17, %v381_v16  ;;  %v416_v33 = vpack.c.bf16 %v398_v21, %v397_v20 }
  0x32   : > { %v353_v34 = vadd.f32 %v1343_v11, %v314_v25  ;;  %v354_v35 = vadd.f32 %v1343_v11, %v315_v26  ;;  %v369_v36 = vadd.f32 %v1343_v11, %v330_v27  ;;  %v409_v38 = vpack.c.bf16 %v384_v28, %v383_v24 }
  0x33   : > { %v370_v37 = vadd.f32 %v1343_v11, %v331_v31  ;;  %v417_v39 = vpack.c.bf16 %v400_v30, %v399_v29 }
  0x34   : > { %v385_v40 = vmax.f32 %v353_v34, 0.0  ;;  %v386_v41 = vmax.f32 %v354_v35, 0.0  ;;  %v401_v42 = vmax.f32 %v369_v36, 0.0 }
  0x35   : > { %v402_v43 = vmax.f32 %v370_v37, 0.0 }
  0x36   : > { %1208 = vmatmul.mubr.bf16.gmra.mrb[8].mxu0 %v408_v32  ;;  %v410_v5 = vpack.c.bf16 %v386_v41, %v385_v40 }
  0x37   : > { %1224 = vmatmul.mubr.bf16.gmra.mrb[8].mxu1 %v416_v33  ;;  %1211 = vmatprep.mubr.bf16.mxu0 %v409_v38  ;;  %v418_v44 = vpack.c.bf16 %v402_v43, %v401_v42 }
  0x38   : > { %1227 = vmatprep.mubr.bf16.mxu1 %v417_v39 }
  0x3e   : > { %1212 = vmatmul.mubr.bf16.gmra.mrb[12].mxu0 %v410_v5 }
  0x3f   : > { %1228 = vmatmul.mubr.bf16.gmra.mrb[12].mxu1 %v418_v44 }
  0xf9   : > { %v1201_v11 = vpop.f32.mrb[0].mxu0 }
  0xfa   : > { %v1217_v46 = vpop.f32.mrb[0].mxu1  ;;  %v533_v47 = vadd.f32 %v1201_v11, %v1436_v45  ;;  %v524_v49 = vpop.f32.mrb[1].mxu0 }
  0xfb   : > { %v597_v48 = vadd.f32 %v1217_v46, %v1436_v45  ;;  %v588_v50 = vpop.f32.mrb[1].mxu1  ;;  %v525_v51 = vadd.f32 %v1436_v45, %v524_v49  ;;  %v1202_v53 = vpop.f32.mrb[2].mxu0 }
  0xfc   : > { %v589_v52 = vadd.f32 %v1436_v45, %v588_v50  ;;  %v1218_v54 = vpop.f32.mrb[2].mxu1  ;;  %v536_v55 = vadd.f32 %v1202_v53, %v1436_v45  ;;  %v527_v57 = vpop.f32.mrb[3].mxu0  ;;  %v653_v61 = vmax.f32 %v533_v47, 0.0 }
  0xfd   : > { %v600_v56 = vadd.f32 %v1218_v54, %v1436_v45  ;;  %v591_v58 = vpop.f32.mrb[3].mxu1  ;;  %v528_v59 = vadd.f32 %v1436_v45, %v527_v57  ;;  %v669_v62 = vmax.f32 %v597_v48, 0.0  ;;  %v651_v1 = vmax.f32 %v525_v51, 0.0 }
  0xfe   : > { %v592_v60 = vadd.f32 %v1436_v45, %v591_v58  ;;  %v654_v63 = vmax.f32 %v536_v55, 0.0  ;;  %v667_v2 = vmax.f32 %v589_v52, 0.0 }
  0xff   : > { %v670_v0 = vmax.f32 %v600_v56, 0.0  ;;  %v652_v3 = vmax.f32 %v528_v59, 0.0 }
 0x100   : > { %v668_v4 = vmax.f32 %v592_v60, 0.0  ;;  %v1057_v6 = vpack.c.bf16 %v654_v63, %v653_v61 }
 0x101   : > { %v1097_v7 = vpack.c.bf16 %v670_v0, %v669_v62  ;;  %v1052_v8 = vpack.c.bf16 %v652_v3, %v651_v1  ;;  %v1205_v10 = vpop.f32.mrb[4].mxu0 }
 0x102   : > { %v1092_v9 = vpack.c.bf16 %v668_v4, %v667_v2  ;;  %v1221_v12 = vpop.f32.mrb[4].mxu1  ;;  %1144 = vst [vmem:[%s1451_s26 + $0x8] sm:$0xff] %v1057_v6   ;;  %v549_v13 = vadd.f32 %v1205_v10, %v1436_v45  ;;  %v540_v15 = vpop.f32.mrb[5].mxu0 }
 0x103   : > { %1152 = vst [vmem:[%s1451_s26 + $0x48] sm:$0xff] %v1097_v7   ;;  %v613_v14 = vadd.f32 %v1221_v12, %v1436_v45  ;;  %v604_v16 = vpop.f32.mrb[5].mxu1  ;;  %1053 = vst [vmem:[%s1451_s26] sm:$0xff] %v1052_v8   ;;  %v541_v17 = vadd.f32 %v1436_v45, %v540_v15  ;;  %v1206_v19 = vpop.f32.mrb[6].mxu0 }
 0x104   : > { %1151 = vst [vmem:[%s1451_s26 + $0x40] sm:$0xff] %v1092_v9   ;;  %v605_v18 = vadd.f32 %v1436_v45, %v604_v16  ;;  %v1222_v20 = vpop.f32.mrb[6].mxu1  ;;  %v552_v21 = vadd.f32 %v1206_v19, %v1436_v45  ;;  %v543_v23 = vpop.f32.mrb[7].mxu0  ;;  %v657_v27 = vmax.f32 %v549_v13, 0.0 }
 0x105   : > { %v616_v22 = vadd.f32 %v1222_v20, %v1436_v45  ;;  %v607_v24 = vpop.f32.mrb[7].mxu1  ;;  %v544_v25 = vadd.f32 %v1436_v45, %v543_v23  ;;  %v673_v28 = vmax.f32 %v613_v14, 0.0  ;;  %v655_v31 = vmax.f32 %v541_v17, 0.0 }
 0x106   : > { %v608_v26 = vadd.f32 %v1436_v45, %v607_v24  ;;  %v658_v29 = vmax.f32 %v552_v21, 0.0  ;;  %v671_v32 = vmax.f32 %v605_v18, 0.0 }
 0x107   : > { %v674_v30 = vmax.f32 %v616_v22, 0.0  ;;  %v656_v33 = vmax.f32 %v544_v25, 0.0 }
 0x108   : > { %v672_v34 = vmax.f32 %v608_v26, 0.0  ;;  %v1067_v35 = vpack.c.bf16 %v658_v29, %v657_v27 }
 0x109   : > { %v1107_v36 = vpack.c.bf16 %v674_v30, %v673_v28  ;;  %v1062_v37 = vpack.c.bf16 %v656_v33, %v655_v31  ;;  %v1209_v39 = vpop.f32.mrb[8].mxu0 }
 0x10a   : > { %v1102_v38 = vpack.c.bf16 %v672_v34, %v671_v32  ;;  %v1225_v40 = vpop.f32.mrb[8].mxu1  ;;  %1146 = vst [vmem:[%s1451_s26 + $0x18] sm:$0xff] %v1067_v35   ;;  %v565_v41 = vadd.f32 %v1209_v39, %v1436_v45  ;;  %v556_v43 = vpop.f32.mrb[9].mxu0 }
 0x10b   : > { %1154 = vst [vmem:[%s1451_s26 + $0x58] sm:$0xff] %v1107_v36   ;;  %v629_v42 = vadd.f32 %v1225_v40, %v1436_v45  ;;  %v620_v5 = vpop.f32.mrb[9].mxu1  ;;  %1145 = vst [vmem:[%s1451_s26 + $0x10] sm:$0xff] %v1062_v37   ;;  %v557_v44 = vadd.f32 %v1436_v45, %v556_v43  ;;  %v1210_v46 = vpop.f32.mrb[10].mxu0 }
 0x10c   : > { %1153 = vst [vmem:[%s1451_s26 + $0x50] sm:$0xff] %v1102_v38   ;;  %v621_v11 = vadd.f32 %v1436_v45, %v620_v5  ;;  %v1226_v47 = vpop.f32.mrb[10].mxu1  ;;  %v568_v48 = vadd.f32 %v1210_v46, %v1436_v45  ;;  %v559_v50 = vpop.f32.mrb[11].mxu0  ;;  %v661_v54 = vmax.f32 %v565_v41, 0.0 }
 0x10d   : > { %v632_v49 = vadd.f32 %v1226_v47, %v1436_v45  ;;  %v623_v51 = vpop.f32.mrb[11].mxu1  ;;  %v560_v52 = vadd.f32 %v1436_v45, %v559_v50  ;;  %v677_v55 = vmax.f32 %v629_v42, 0.0  ;;  %v659_v58 = vmax.f32 %v557_v44, 0.0 }
 0x10e   : > { %v624_v53 = vadd.f32 %v1436_v45, %v623_v51  ;;  %v662_v56 = vmax.f32 %v568_v48, 0.0  ;;  %v675_v59 = vmax.f32 %v621_v11, 0.0 }
 0x10f   : > { %v678_v57 = vmax.f32 %v632_v49, 0.0  ;;  %v660_v60 = vmax.f32 %v560_v52, 0.0 }
 0x110   : > { %v676_v61 = vmax.f32 %v624_v53, 0.0  ;;  %v1077_v62 = vpack.c.bf16 %v662_v56, %v661_v54 }
 0x111   : > { %v1117_v63 = vpack.c.bf16 %v678_v57, %v677_v55  ;;  %v1072_v0 = vpack.c.bf16 %v660_v60, %v659_v58  ;;  %v1213_v2 = vpop.f32.mrb[12].mxu0 }
 0x112   : > { %v1112_v1 = vpack.c.bf16 %v676_v61, %v675_v59  ;;  %v1229_v3 = vpop.f32.mrb[12].mxu1  ;;  %1148 = vst [vmem:[%s1451_s26 + $0x28] sm:$0xff] %v1077_v62   ;;  %v581_v4 = vadd.f32 %v1213_v2, %v1436_v45  ;;  %v572_v7 = vpop.f32.mrb[13].mxu0 }
 0x113   : > { %1156 = vst [vmem:[%s1451_s26 + $0x68] sm:$0xff] %v1117_v63   ;;  %v645_v6 = vadd.f32 %v1229_v3, %v1436_v45  ;;  %v636_v8 = vpop.f32.mrb[13].mxu1  ;;  %1147 = vst [vmem:[%s1451_s26 + $0x20] sm:$0xff] %v1072_v0   ;;  %v573_v9 = vadd.f32 %v1436_v45, %v572_v7  ;;  %v1214_v12 = vpop.f32.mrb[14].mxu0 }
 0x114   : > { %1155 = vst [vmem:[%s1451_s26 + $0x60] sm:$0xff] %v1112_v1   ;;  %v637_v10 = vadd.f32 %v1436_v45, %v636_v8  ;;  %v1230_v13 = vpop.f32.mrb[14].mxu1  ;;  %v584_v14 = vadd.f32 %v1214_v12, %v1436_v45  ;;  %v575_v16 = vpop.f32.mrb[15].mxu0  ;;  %v665_v20 = vmax.f32 %v581_v4, 0.0 }
 0x115   : > { %v648_v15 = vadd.f32 %v1230_v13, %v1436_v45  ;;  %v639_v17 = vpop.f32.mrb[15].mxu1  ;;  %v576_v18 = vadd.f32 %v1436_v45, %v575_v16  ;;  %v681_v21 = vmax.f32 %v645_v6, 0.0  ;;  %v663_v24 = vmax.f32 %v573_v9, 0.0 }
 0x116   : > { %v640_v19 = vadd.f32 %v1436_v45, %v639_v17  ;;  %v666_v22 = vmax.f32 %v584_v14, 0.0  ;;  %v679_v25 = vmax.f32 %v637_v10, 0.0 }
 0x117   : > { %v682_v23 = vmax.f32 %v648_v15, 0.0  ;;  %v664_v26 = vmax.f32 %v576_v18, 0.0 }
 0x118   : > { %v680_v27 = vmax.f32 %v640_v19, 0.0  ;;  %v1087_v28 = vpack.c.bf16 %v666_v22, %v665_v20 }
 0x119   : > { %v1127_v29 = vpack.c.bf16 %v682_v23, %v681_v21  ;;  %v1082_v30 = vpack.c.bf16 %v664_v26, %v663_v24 }
 0x11a   : > { %v1122_v31 = vpack.c.bf16 %v680_v27, %v679_v25  ;;  %1150 = vst [vmem:[%s1451_s26 + $0x38] sm:$0xff] %v1087_v28  }
 0x11b   : > { %1158 = vst [vmem:[%s1451_s26 + $0x78] sm:$0xff] %v1127_v29   ;;  %1149 = vst [vmem:[%s1451_s26 + $0x30] sm:$0xff] %v1082_v30  }
 0x11c   : > { %1157 = vst [vmem:[%s1451_s26 + $0x70] sm:$0xff] %v1122_v31  }
 0x11d PF: > { %s15_s18 = sadd.s32 1, %s1269_s18  }
 0x11e   : > { %p12_p4 = scmp.ge.s32.totalorder %s15_s18, 4  }
 0x120   :  { %14 = sbr.rel (!%p12_p4) target bundleno = 1 (0x1), region = 70 }

// kernel: bottleneck_v2_forward.3
= control target key start
LH: loop header
LB: loop body
LE: loop exit
PB: predicated region body
PF: predicated region fallthrough
CT: control target
= control target key end

     0   :  { %s2235_s21 = smov 0   ;;  %s2631_s0 = inlined_call_operand.vmem [shape: bf16[2,18,2,9,128], index: 0, kind: input, shape index: {}]   ;;  %s2632_s1 = inlined_call_operand.vmem [shape: f32[2,8,8,128], index: 1, kind: input, shape index: {}]   ;;  %s2633_s2 = inlined_call_operand.vmem [shape: bf16[9,128,128], index: 2, kind: input, shape index: {}]   ;;  %s2634_s3 = inlined_call_operand.vmem [shape: f32[1,128], index: 3, kind: input, shape index: {}]   ;;  %s2635_s4 = inlined_call_operand.vmem [shape: bf16[128,128], index: 4, kind: input, shape index: {}]   ;;  %s2636_s5 = inlined_call_operand.vmem [shape: f32[1,128], index: 5, kind: input, shape index: {}]   ;;  %s2637_s6 = inlined_call_operand.vmem [shape: f32[2,8,8,128], index: 6, kind: output, shape index: {}]  }
   0x1 LB: > { %s1529_s22 = sadd.s32 4294967295, %s2192_s21   ;;  %p1533_p0 = scmp.ge.s32.totalorder %s2192_s21, 1  ;;  %s2192_s21 = sphi %s2235_s21, %s16_s21  }
   0x2   : > { %p222_p1 = scmp.lt.s32.totalorder %s2192_s21, 3 }
   0x4   : > { %p223_p2 = pnand %p1533_p0, %p222_p1 }
   0x5   : > { %p257_p3 = scmp.lt.s32.totalorder (!%p223_p2), %s1529_s22, 1  ;;  %s2258_s10 = smov (!%p223_p2), 0  }
   0x6   : > { %226 = sbr.rel (%p223_p2) target bundleno = 615 (0x267), region = 44 }
   0xd   : > { %s2639_s22 = smov (!%p257_p3, %s1529_s22), 1 }
   0xe   : > { %s2080_s23 = smul.u32 288, %s2639_s22  ;;  %s1779_s24 = sshll.u32 %s2639_s22, 6 }
   0xf   : > { %s2246_s27 = scalar_lea.vmem %s2632_s1, %s1779_s24  ;;  %s2251_s30 = scalar_lea.vmem %s2637_s6, %s1779_s24 }
  0x10   : > { %s2256_s9 = scalar_lea.vmem %s2631_s0, %s2080_s23 }
  0x11 LB: >> { %v2099_v0 = vld [vmem:[%s2633_s2 + $0x40] sm:$0xff]   ;;  %v2198_v1 = vmov 0.0   ;;  %v2101_v3 = vld [vmem:[%s2633_s2 + $0x48] sm:$0xff]   ;;  %vm2199_vm0 = vmmov 0   ;;  %v2103_v5 = vld [vmem:[%s2633_s2 + $0x50] sm:$0xff]   ;;  %s1782_s18 = sshll.u32 %s2196_s10, 5  ;;  %s2196_s10 = sphi %s2258_s10, %s278_s10  }
  0x12   : >> { %1880 = vmatprep.subr.bf16.mxu0 %v2198_v1  ;;  %1900 = vmatprep.subr.bf16.mxu1 %v2198_v1  ;;  %v2100_v2 = vld [vmem:[%s2633_s2] sm:$0xff]   ;;  %v2102_v4 = vld [vmem:[%s2633_s2 + $0x8] sm:$0xff]   ;;  %v2104_v6 = vld [vmem:[%s2633_s2 + $0x10] sm:$0xff]   ;;  %s2325_s22 = scalar_lea.vmem %s2256_s9, %s1782_s18 }
  0x13   : >> { %1881 = vmatpush3.bf16.msra.mxu0 %v2099_v0  ;;  %1896 = vmatprep.mubr.msk.bf16.mxu0 %vm2199_vm0, %v2198_v1  ;;  %v2105_v7 = vld [vmem:[%s2633_s2 + $0x58] sm:$0xff]   ;;  %v2107_v9 = vld [vmem:[%s2633_s2 + $0x60] sm:$0xff]   ;;  %v2109_v11 = vld [vmem:[%s2633_s2 + $0x68] sm:$0xff]  }
  0x14   : >> { %1901 = vmatpush3.bf16.msra.mxu1 %v2100_v2  ;;  %1882 = vmatprep.subr.bf16.mxu0 %v2198_v1  ;;  %v2106_v8 = vld [vmem:[%s2633_s2 + $0x18] sm:$0xff]   ;;  %v2108_v10 = vld [vmem:[%s2633_s2 + $0x20] sm:$0xff]   ;;  %v2110_v12 = vld [vmem:[%s2633_s2 + $0x28] sm:$0xff]  }
  0x15   : >> { %1902 = vmatprep.subr.bf16.mxu1 %v2198_v1  ;;  %1916 = vmatprep.mubr.msk.bf16.mxu1 %vm2199_vm0, %v2198_v1  ;;  %v2111_v13 = vld [vmem:[%s2633_s2 + $0x70] sm:$0xff]   ;;  %v2113_v15 = vld [vmem:[%s2633_s2 + $0x78] sm:$0xff]   ;;  %v1544_v17 = vld [vmem:[%s2325_s22 + $0x8] sm:$0xf] }
  0x16   : >> { %v2112_v14 = vld [vmem:[%s2633_s2 + $0x30] sm:$0xff]   ;;  %v2114_v16 = vld [vmem:[%s2633_s2 + $0x38] sm:$0xff]   ;;  %v283_v18 = vld [vmem:[%s2325_s22] sm:$0xf] }
  0x17   : >> { %1883 = vmatpush3.bf16.msra.mxu0 %v2101_v3  ;;  %v2115_v19 = vld [vmem:[%s2633_s2 + $0x80] sm:$0xff]   ;;  %v2117_v21 = vld [vmem:[%s2633_s2 + $0x88] sm:$0xff]   ;;  %v2119_v23 = vld [vmem:[%s2633_s2 + $0x90] sm:$0xff]  }
  0x18   : >> { %1903 = vmatpush3.bf16.msra.mxu1 %v2102_v4  ;;  %1884 = vmatprep.subr.bf16.mxu0 %v2198_v1  ;;  %v2116_v20 = vld [vmem:[%s2633_s2 + $0xc0] sm:$0xff]   ;;  %v2118_v22 = vld [vmem:[%s2633_s2 + $0xc8] sm:$0xff]   ;;  %v2120_v24 = vld [vmem:[%s2633_s2 + $0xd0] sm:$0xff]  }
  0x19   : >> { %1904 = vmatprep.subr.bf16.mxu1 %v2198_v1  ;;  %v2121_v25 = vld [vmem:[%s2633_s2 + $0x98] sm:$0xff]   ;;  %v2123_v27 = vld [vmem:[%s2633_s2 + $0xa0] sm:$0xff]   ;;  %v2125_v30 = vld [vmem:[%s2633_s2 + $0xa8] sm:$0xff]  }
  0x1a   : >> { %v2122_v26 = vld [vmem:[%s2633_s2 + $0xd8] sm:$0xff]   ;;  %v2124_v28 = vld [vmem:[%s2633_s2 + $0xe0] sm:$0xff]   ;;  %v2126_v31 = vld [vmem:[%s2633_s2 + $0xe8] sm:$0xff]  }
  0x1b   : >> { %1885 = vmatpush3.bf16.msra.mxu0 %v2103_v5  ;;  %v2131_v29 = vld [vmem:[%s2325_s22] sm:$0x1f]   ;;  %v2127_v33 = vld [vmem:[%s2633_s2 + $0xb0] sm:$0xff]   ;;  %v2129_v37 = vld [vmem:[%s2633_s2 + $0xb8] sm:$0xff]  }
  0x1c   : >> { %1905 = vmatpush3.bf16.msra.mxu1 %v2104_v6  ;;  %1886 = vmatprep.subr.bf16.mxu0 %v2198_v1  ;;  %v524_v32 = vshll.u32 %v2131_v29, 16  ;;  %v2128_v34 = vld [vmem:[%s2633_s2 + $0xf0] sm:$0xff]   ;;  %v522_v35 = vshrl.u32 %v2131_v29, 16  ;;  %v2130_v38 = vld [vmem:[%s2633_s2 + $0xf8] sm:$0xff]   ;;  %v2132_v40 = vld [vmem:[%s2633_s2 + $0x100] sm:$0xff]  }
  0x1d   : >> { %1906 = vmatprep.subr.bf16.mxu1 %v2198_v1  ;;  %v1604_v41 = vld [vmem:[%s2325_s22 + $0x10] sm:$0xf]  ;;  %v2133_v42 = vld [vmem:[%s2633_s2 + $0x140] sm:$0xff]   ;;  %v2134_v43 = vld [vmem:[%s2633_s2 + $0x108] sm:$0xff]  }
  0x1e   : >> { %v526_v36 = vrot.slane %v524_v32, 1  ;;  %v2135_v44 = vld [vmem:[%s2633_s2 + $0x148] sm:$0xff]   ;;  %v2136_v45 = vld [vmem:[%s2633_s2 + $0x110] sm:$0xff]   ;;  %v2138_v47 = vld [vmem:[%s2633_s2 + $0x118] sm:$0xff]  }
  0x1f   : >> { %1887 = vmatpush3.bf16.msra.mxu0 %v2105_v7  ;;  %v2137_v46 = vld [vmem:[%s2633_s2 + $0x150] sm:$0xff]   ;;  %v2139_v48 = vld [vmem:[%s2633_s2 + $0x158] sm:$0xff]   ;;  %v2140_v49 = vld [vmem:[%s2633_s2 + $0x120] sm:$0xff]  }
  0x20   : >> { %1907 = vmatpush3.bf16.msra.mxu1 %v2106_v8  ;;  %1888 = vmatprep.subr.bf16.mxu0 %v2198_v1  ;;  %v527_v39 = vor.u32 %v526_v36, %v522_v35  ;;  %v2141_v50 = vld [vmem:[%s2633_s2 + $0x160] sm:$0xff]   ;;  %v2142_v51 = vld [vmem:[%s2633_s2 + $0x128] sm:$0xff]   ;;  %v2149_v52 = vld [vmem:[%s2325_s22 + $0x10] sm:$0x1f]  }
  0x21   : >> { %1908 = vmatprep.subr.bf16.mxu1 %v2198_v1  ;;  %v2143_v53 = vld [vmem:[%s2633_s2 + $0x168] sm:$0xff]   ;;  %v2144_v54 = vld [vmem:[%s2633_s2 + $0x130] sm:$0xff]   ;;  %v866_v55 = vshll.u32 %v2149_v52, 16  ;;  %v2146_v57 = vld [vmem:[%s2633_s2 + $0x138] sm:$0xff]   ;;  %v864_v58 = vshrl.u32 %v2149_v52, 16 }
  0x22   : >> { %v2145_v56 = vld [vmem:[%s2633_s2 + $0x170] sm:$0xff]   ;;  %v2147_v60 = vld [vmem:[%s2633_s2 + $0x178] sm:$0xff]   ;;  %v2148_v62 = vld [vmem:[%s2633_s2 + $0x180] sm:$0xff]  }
  0x23   : >> { %1889 = vmatpush3.bf16.msra.mxu0 %v2107_v9  ;;  %v868_v59 = vrot.slane %v866_v55, 1  ;;  %v1632_v61 = vld [vmem:[%s2325_s22 + $0x18] sm:$0xf]  ;;  %v2150_v0 = vld [vmem:[%s2633_s2 + $0x1c0] sm:$0xff]   ;;  %v2151_v2 = vld [vmem:[%s2633_s2 + $0x188] sm:$0xff]  }
  0x24   : >> { %1909 = vmatpush3.bf16.msra.mxu1 %v2108_v10  ;;  %1890 = vmatprep.subr.bf16.mxu0 %v2198_v1  ;;  %v2152_v3 = vld [vmem:[%s2633_s2 + $0x1c8] sm:$0xff]   ;;  %v2153_v4 = vld [vmem:[%s2633_s2 + $0x190] sm:$0xff]   ;;  %v2155_v6 = vld [vmem:[%s2633_s2 + $0x198] sm:$0xff]  }
  0x25   : >> { %1910 = vmatprep.subr.bf16.mxu1 %v2198_v1  ;;  %v869_v63 = vor.u32 %v868_v59, %v864_v58  ;;  %v2154_v5 = vld [vmem:[%s2633_s2 + $0x1d0] sm:$0xff]   ;;  %v2156_v7 = vld [vmem:[%s2633_s2 + $0x1d8] sm:$0xff]   ;;  %v2157_v8 = vld [vmem:[%s2633_s2 + $0x1a0] sm:$0xff]  }
  0x26   : >> { %v2158_v9 = vld [vmem:[%s2633_s2 + $0x1e0] sm:$0xff]   ;;  %v2159_v10 = vld [vmem:[%s2633_s2 + $0x1a8] sm:$0xff]   ;;  %v2172_v29 = vld [vmem:[%s2633_s2 + $0x238] sm:$0xff]  }
  0x27   : >> { %1891 = vmatpush3.bf16.msra.mxu0 %v2109_v11  ;;  %v2160_v11 = vld [vmem:[%s2633_s2 + $0x1e8] sm:$0xff]   ;;  %v2178_v35 = vld [vmem:[%s2635_s4 + $0x20] sm:$0xff]  }
  0x28   : >> { %1911 = vmatpush3.bf16.msra.mxu1 %v2110_v12  ;;  %1892 = vmatprep.subr.bf16.mxu0 %v2198_v1  ;;  %v2161_v12 = vld [vmem:[%s2633_s2 + $0x1b0] sm:$0xff]   ;;  %v2175_v32 = vld [vmem:[%s2635_s4 + $0x8] sm:$0xff]  }
  0x29   : >> { %1912 = vmatprep.subr.bf16.mxu1 %v2198_v1  ;;  %v2179_v36 = vld [vmem:[%s2635_s4 + $0x28] sm:$0xff]  }
  0x2b   : >> { %1893 = vmatpush3.bf16.msra.mxu0 %v2111_v13  ;;  %v2162_v13 = vld [vmem:[%s2633_s2 + $0x1f0] sm:$0xff]  }
  0x2c   : >> { %1913 = vmatpush3.bf16.msra.mxu1 %v2112_v14  ;;  %1894 = vmatprep.subr.bf16.mxu0 %v2198_v1  ;;  %v2163_v14 = vld [vmem:[%s2633_s2 + $0x1b8] sm:$0xff]  }
  0x2d   : >> { %1914 = vmatprep.subr.bf16.mxu1 %v2198_v1 }
  0x2f   : >> { %1895 = vmatpush3.bf16.msra.mxu0 %v2113_v15  ;;  %v2164_v15 = vld [vmem:[%s2633_s2 + $0x1f8] sm:$0xff]  }
  0x30   : >> { %1915 = vmatpush3.bf16.msra.mxu1 %v2114_v16  ;;  %1920 = vmatprep.subr.bf16.mxu0 %v2198_v1  ;;  %v1686_v16 = vld [vmem:[%s2325_s22 + $0x20] sm:$0xf] }
  0x31   : >> { %1940 = vmatprep.subr.bf16.mxu1 %v2198_v1 }
  0x32   : >> { %1897 = vmatmul.mubr.bf16.vlgmr.msra.gmra.mrb[0].mxu0 %v1544_v17  ;;  %v2165_v17 = vld [vmem:[%s2633_s2 + $0x200] sm:$0xff]  }
  0x33   : >> { %1917 = vmatmul.mubr.bf16.vlgmr.msra.gmra.mrb[0].mxu1 %v283_v18  ;;  %1921 = vmatpush3.bf16.msra.mxu0 %v2115_v19  ;;  %v1714_v18 = vld [vmem:[%s2325_s22 + $0x28] sm:$0xf] }
  0x34   : >> { %1941 = vmatpush3.bf16.msra.mxu1 %v2116_v20  ;;  %1922 = vmatprep.subr.bf16.mxu0 %v2198_v1  ;;  %v2166_v19 = vld [vmem:[%s2633_s2 + $0x208] sm:$0xff]   ;;  %v2167_v20 = vld [vmem:[%s2633_s2 + $0x210] sm:$0xff]  }
  0x35   : >> { %1942 = vmatprep.subr.bf16.mxu1 %v2198_v1  ;;  %1936 = vmatprep.mubr.msk.bf16.mxu0 %vm2199_vm0, %v2198_v1 }
  0x36   : >> { %1956 = vmatprep.mubr.msk.bf16.mxu1 %vm2199_vm0, %v2198_v1 }
  0x37   : >> { %1923 = vmatpush3.bf16.msra.mxu0 %v2117_v21  ;;  %v2168_v21 = vld [vmem:[%s2633_s2 + $0x218] sm:$0xff]  }
  0x38   : >> { %1943 = vmatpush3.bf16.msra.mxu1 %v2118_v22  ;;  %1924 = vmatprep.subr.bf16.mxu0 %v2198_v1  ;;  %v2169_v22 = vld [vmem:[%s2633_s2 + $0x220] sm:$0xff]  }
  0x39   : >> { %1944 = vmatprep.subr.bf16.mxu1 %v2198_v1 }
  0x3b   : >> { %1925 = vmatpush3.bf16.msra.mxu0 %v2119_v23  ;;  %v2173_v23 = vld [vmem:[%s2325_s22 + $0x20] sm:$0x1f]   ;;  %s1776_s22 = sshll.u32 %s2196_s10, 3  ;;  %s278_s10 = sadd.s32 1, %s2196_s10  }
  0x3c   : >> { %1945 = vmatpush3.bf16.msra.mxu1 %v2120_v24  ;;  %1926 = vmatprep.subr.bf16.mxu0 %v2198_v1  ;;  %v2170_v24 = vld [vmem:[%s2633_s2 + $0x228] sm:$0xff]   ;;  %s1424_s8 = scalar_lea.vmem %s2246_s27, %s1776_s22  ;;  %s1427_s13 = scalar_lea.vmem %s2251_s30, %s1776_s22 }
  0x3d   : >> { %1946 = vmatprep.subr.bf16.mxu1 %v2198_v1  ;;  %p275_p4 = scmp.ge.s32.totalorder %s278_s10, 8  }
  0x3f   : >> { %1927 = vmatpush3.bf16.msra.mxu0 %v2121_v25  ;;  %v1208_v25 = vshll.u32 %v2173_v23, 16 }
  0x40   : >> { %1947 = vmatpush3.bf16.msra.mxu1 %v2122_v26  ;;  %1928 = vmatprep.subr.bf16.mxu0 %v2198_v1  ;;  %v2171_v26 = vld [vmem:[%s2633_s2 + $0x230] sm:$0xff]  }
  0x41   : >> { %1948 = vmatprep.subr.bf16.mxu1 %v2198_v1 }
  0x43   : >> { %1929 = vmatpush3.bf16.msra.mxu0 %v2123_v27  ;;  %v1206_v27 = vshrl.u32 %v2173_v23, 16  ;;  %v1767_v23 = vld [vmem:[%s2636_s5] ss:$0 sm:$0xff] }
  0x44   : >> { %1949 = vmatpush3.bf16.msra.mxu1 %v2124_v28  ;;  %1930 = vmatprep.subr.bf16.mxu0 %v2198_v1  ;;  %v1210_v28 = vrot.slane %v1208_v25, 1  ;;  %v1425_v25 = vld [vmem:[%s1424_s8] sm:$0xff] }
  0x45   : >> { %1950 = vmatprep.subr.bf16.mxu1 %v2198_v1 }
  0x47   : >> { %1931 = vmatpush3.bf16.msra.mxu0 %v2125_v30  ;;  %v1211_v30 = vor.u32 %v1210_v28, %v1206_v27 }
  0x48   : >> { %1951 = vmatpush3.bf16.msra.mxu1 %v2126_v31  ;;  %1932 = vmatprep.subr.bf16.mxu0 %v2198_v1  ;;  %v2174_v31 = vld [vmem:[%s2635_s4] sm:$0xff]  }
  0x49   : >> { %1952 = vmatprep.subr.bf16.mxu1 %v2198_v1 }
  0x4b   : >> { %1933 = vmatpush3.bf16.msra.mxu0 %v2127_v33  ;;  %v2176_v33 = vld [vmem:[%s2635_s4 + $0x10] sm:$0xff]  }
  0x4c   : >> { %1953 = vmatpush3.bf16.msra.mxu1 %v2128_v34  ;;  %1934 = vmatprep.subr.bf16.mxu0 %v2198_v1  ;;  %v2177_v34 = vld [vmem:[%s2635_s4 + $0x18] sm:$0xff]  }
  0x4d   : >> { %1954 = vmatprep.subr.bf16.mxu1 %v2198_v1 }
  0x4f   : >> { %1935 = vmatpush3.bf16.msra.mxu0 %v2129_v37 }
  0x50   : >> { %1955 = vmatpush3.bf16.msra.mxu1 %v2130_v38  ;;  %1960 = vmatprep.subr.bf16.mxu0 %v2198_v1  ;;  %v2180_v38 = vld [vmem:[%s2635_s4 + $0x30] sm:$0xff]  }
  0x51   : >> { %1980 = vmatprep.subr.bf16.mxu1 %v2198_v1 }
  0x52   : >> { %1937 = vmatmul.mubr.bf16.vlgmr.msra.gmra.mrb[4].mxu0 %v527_v39 }
  0x53   : >> { %1961 = vmatpush3.bf16.msra.mxu0 %v2132_v40  ;;  %1957 = vmatmul.mubr.bf16.vlgmr.msra.gmra.mrb[4].mxu1 %v1604_v41 }
  0x54   : >> { %1981 = vmatpush3.bf16.msra.mxu1 %v2133_v42  ;;  %1962 = vmatprep.subr.bf16.mxu0 %v2198_v1 }
  0x55   : >> { %1982 = vmatprep.subr.bf16.mxu1 %v2198_v1  ;;  %1976 = vmatprep.mubr.msk.bf16.mxu0 %vm2199_vm0, %v2198_v1 }
  0x56   : >> { %1996 = vmatprep.mubr.msk.bf16.mxu1 %vm2199_vm0, %v2198_v1 }
  0x57   : >> { %1963 = vmatpush3.bf16.msra.mxu0 %v2134_v43 }
  0x58   : >> { %1983 = vmatpush3.bf16.msra.mxu1 %v2135_v44  ;;  %1964 = vmatprep.subr.bf16.mxu0 %v2198_v1 }
  0x59   : >> { %1984 = vmatprep.subr.bf16.mxu1 %v2198_v1 }
  0x5b   : >> { %1965 = vmatpush3.bf16.msra.mxu0 %v2136_v45 }
  0x5c   : >> { %1985 = vmatpush3.bf16.msra.mxu1 %v2137_v46  ;;  %1966 = vmatprep.subr.bf16.mxu0 %v2198_v1 }
  0x5d   : >> { %1986 = vmatprep.subr.bf16.mxu1 %v2198_v1 }
  0x5f   : >> { %1967 = vmatpush3.bf16.msra.mxu0 %v2138_v47  ;;  %v2181_v47 = vld [vmem:[%s2635_s4 + $0x38] sm:$0xff]  }
  0x60   : >> { %1987 = vmatpush3.bf16.msra.mxu1 %v2139_v48  ;;  %1968 = vmatprep.subr.bf16.mxu0 %v2198_v1 }
  0x61   : >> { %1988 = vmatprep.subr.bf16.mxu1 %v2198_v1 }
  0x63   : >> { %1969 = vmatpush3.bf16.msra.mxu0 %v2140_v49 }
  0x64   : >> { %1989 = vmatpush3.bf16.msra.mxu1 %v2141_v50  ;;  %1970 = vmatprep.subr.bf16.mxu0 %v2198_v1 }
  0x65   : >> { %1990 = vmatprep.subr.bf16.mxu1 %v2198_v1 }
  0x67   : >> { %1971 = vmatpush3.bf16.msra.mxu0 %v2142_v51 }
  0x68   : >> { %1991 = vmatpush3.bf16.msra.mxu1 %v2143_v53  ;;  %1972 = vmatprep.subr.bf16.mxu0 %v2198_v1 }
  0x69   : >> { %1992 = vmatprep.subr.bf16.mxu1 %v2198_v1 }
  0x6b   : >> { %1973 = vmatpush3.bf16.msra.mxu0 %v2144_v54 }
  0x6c   : >> { %1993 = vmatpush3.bf16.msra.mxu1 %v2145_v56  ;;  %1974 = vmatprep.subr.bf16.mxu0 %v2198_v1 }
  0x6d   : >> { %1994 = vmatprep.subr.bf16.mxu1 %v2198_v1 }
  0x6f   : >> { %1975 = vmatpush3.bf16.msra.mxu0 %v2146_v57 }
  0x70   : >> { %1995 = vmatpush3.bf16.msra.mxu1 %v2147_v60  ;;  %2000 = vmatprep.subr.bf16.mxu0 %v2198_v1 }
  0x71   : >> { %2020 = vmatprep.subr.bf16.mxu1 %v2198_v1 }
  0x72   : >> { %1977 = vmatmul.mubr.bf16.vlgmr.msra.gmra.mrb[8].mxu0 %v1632_v61 }
  0x73   : >> { %2001 = vmatpush3.bf16.msra.mxu0 %v2148_v62  ;;  %1997 = vmatmul.mubr.bf16.vlgmr.msra.gmra.mrb[8].mxu1 %v869_v63 }
  0x74   : >> { %2021 = vmatpush3.bf16.msra.mxu1 %v2150_v0  ;;  %2002 = vmatprep.subr.bf16.mxu0 %v2198_v1 }
  0x75   : >> { %2022 = vmatprep.subr.bf16.mxu1 %v2198_v1  ;;  %2016 = vmatprep.mubr.msk.bf16.mxu0 %vm2199_vm0, %v2198_v1 }
  0x76   : >> { %2036 = vmatprep.mubr.msk.bf16.mxu1 %vm2199_vm0, %v2198_v1 }
  0x77   : >> { %2003 = vmatpush3.bf16.msra.mxu0 %v2151_v2 }
  0x78   : >> { %2023 = vmatpush3.bf16.msra.mxu1 %v2152_v3  ;;  %2004 = vmatprep.subr.bf16.mxu0 %v2198_v1 }
  0x79   : >> { %2024 = vmatprep.subr.bf16.mxu1 %v2198_v1 }
  0x7b   : >> { %2005 = vmatpush3.bf16.msra.mxu0 %v2153_v4 }
  0x7c   : >> { %2025 = vmatpush3.bf16.msra.mxu1 %v2154_v5  ;;  %2006 = vmatprep.subr.bf16.mxu0 %v2198_v1 }
  0x7d   : >> { %2026 = vmatprep.subr.bf16.mxu1 %v2198_v1 }
  0x7f   : >> { %2007 = vmatpush3.bf16.msra.mxu0 %v2155_v6 }
  0x80   : >> { %2027 = vmatpush3.bf16.msra.mxu1 %v2156_v7  ;;  %2008 = vmatprep.subr.bf16.mxu0 %v2198_v1 }
  0x81   : >> { %2028 = vmatprep.subr.bf16.mxu1 %v2198_v1 }
  0x83   : >> { %2009 = vmatpush3.bf16.msra.mxu0 %v2157_v8 }
  0x84   : >> { %2029 = vmatpush3.bf16.msra.mxu1 %v2158_v9  ;;  %2010 = vmatprep.subr.bf16.mxu0 %v2198_v1 }
  0x85   : >> { %2030 = vmatprep.subr.bf16.mxu1 %v2198_v1 }
  0x87   : >> { %2011 = vmatpush3.bf16.msra.mxu0 %v2159_v10 }
  0x88   : >> { %2031 = vmatpush3.bf16.msra.mxu1 %v2160_v11  ;;  %2012 = vmatprep.subr.bf16.mxu0 %v2198_v1 }
  0x89   : >> { %2032 = vmatprep.subr.bf16.mxu1 %v2198_v1 }
  0x8b   : >> { %2013 = vmatpush3.bf16.msra.mxu0 %v2161_v12 }
  0x8c   : >> { %2033 = vmatpush3.bf16.msra.mxu1 %v2162_v13  ;;  %2014 = vmatprep.subr.bf16.mxu0 %v2198_v1 }
  0x8d   : >> { %2034 = vmatprep.subr.bf16.mxu1 %v2198_v1 }
  0x8f   : >> { %2015 = vmatpush3.bf16.msra.mxu0 %v2163_v14 }
  0x90   : >> { %2035 = vmatpush3.bf16.msra.mxu1 %v2164_v15  ;;  %2040 = vmatprep.subr.bf16.mxu0 %v2198_v1  ;;  %v1766_v15 = vld [vmem:[%s2634_s3] ss:$0 sm:$0xff] }
  0x91   : >> { %2060 = vmatprep.subr.bf16.mxu1 %v2198_v1 }
  0x92   : >> { %2017 = vmatmul.mubr.bf16.vlgmr.msra.gmra.mrb[12].mxu0 %v1686_v16 }
  0x93   : >> { %2041 = vmatpush3.bf16.msra.mxu0 %v2165_v17  ;;  %2037 = vmatmul.mubr.bf16.vlgmr.msra.gmra.mrb[12].mxu1 %v1714_v18 }
  0x94   : >> { %2042 = vmatprep.subr.bf16.mxu0 %v2198_v1  ;;  %2056 = vmatprep.mubr.msk.bf16.mxu0 %vm2199_vm0, %v2198_v1 }
  0x95   : >> { %2076 = vmatprep.mubr.msk.bf16.mxu1 %vm2199_vm0, %v2198_v1  ;;  %2061 = vmatpush3.bf16.msra.mxu1 %v2174_v31 }
  0x96   : >> { %2062 = vmatprep.subr.bf16.mxu1 %v2198_v1 }
  0x97   : >> { %2043 = vmatpush3.bf16.msra.mxu0 %v2166_v19 }
  0x98   : >> { %2044 = vmatprep.subr.bf16.mxu0 %v2198_v1 }
  0x99   : >> { %2063 = vmatpush3.bf16.msra.mxu1 %v2175_v32 }
  0x9a   : >> { %2064 = vmatprep.subr.bf16.mxu1 %v2198_v1 }
  0x9b   : >> { %2045 = vmatpush3.bf16.msra.mxu0 %v2167_v20 }
  0x9c   : >> { %2046 = vmatprep.subr.bf16.mxu0 %v2198_v1 }
  0x9d   : >> { %2065 = vmatpush3.bf16.msra.mxu1 %v2176_v33 }
  0x9e   : >> { %2066 = vmatprep.subr.bf16.mxu1 %v2198_v1 }
  0x9f   : >> { %2047 = vmatpush3.bf16.msra.mxu0 %v2168_v21 }
  0xa0   : >> { %2048 = vmatprep.subr.bf16.mxu0 %v2198_v1 }
  0xa1   : >> { %2067 = vmatpush3.bf16.msra.mxu1 %v2177_v34 }
  0xa2   : >> { %2068 = vmatprep.subr.bf16.mxu1 %v2198_v1 }
  0xa3   : >> { %2049 = vmatpush3.bf16.msra.mxu0 %v2169_v22 }
  0xa4   : >> { %2050 = vmatprep.subr.bf16.mxu0 %v2198_v1 }
  0xa5   : >> { %2069 = vmatpush3.bf16.msra.mxu1 %v2178_v35 }
  0xa6   : >> { %2070 = vmatprep.subr.bf16.mxu1 %v2198_v1 }
  0xa7   : >> { %2051 = vmatpush3.bf16.msra.mxu0 %v2170_v24 }
  0xa8   : >> { %2052 = vmatprep.subr.bf16.mxu0 %v2198_v1 }
  0xa9   : >> { %2071 = vmatpush3.bf16.msra.mxu1 %v2179_v36 }
  0xaa   : >> { %2072 = vmatprep.subr.bf16.mxu1 %v2198_v1 }
  0xab   : >> { %2053 = vmatpush3.bf16.msra.mxu0 %v2171_v26 }
  0xac   : >> { %2054 = vmatprep.subr.bf16.mxu0 %v2198_v1 }
  0xad   : >> { %2073 = vmatpush3.bf16.msra.mxu1 %v2180_v38 }
  0xae   : >> { %2074 = vmatprep.subr.bf16.mxu1 %v2198_v1 }
  0xaf   : >> { %2055 = vmatpush3.bf16.msra.mxu0 %v2172_v29 }
  0xb1   : >> { %2075 = vmatpush3.bf16.msra.mxu1 %v2181_v47 }
  0xb2   : >> { %2057 = vmatmul.mubr.bf16.vlgmr.msra.gmra.mrb[16].mxu0 %v1211_v30 }
 0x105   : >> { %v403_v37 = vpop.f32.mrb[0].mxu0 }
 0x106   : >> { %v1898_v39 = vpop.f32.mrb[1].mxu0  ;;  %v491_v40 = vpop.f32.mrb[0].mxu1 }
 0x107   : >> { %v492_v41 = vadd.f32 %v491_v40, %v403_v37  ;;  %v406_v42 = vpop.f32.mrb[2].mxu0  ;;  %v1918_v43 = vpop.f32.mrb[1].mxu1 }
 0x108   : >> { %v1899_v44 = vpop.f32.mrb[3].mxu0  ;;  %v494_v45 = vpop.f32.mrb[2].mxu1 }
 0x109   : >> { %v1919_v46 = vpop.f32.mrb[3].mxu1 }
 0x125   : >> { %v611_v48 = vpop.f32.mrb[4].mxu0 }
 0x126   : >> { %v617_v49 = vadd.f32 %v611_v48, %v492_v41  ;;  %v1938_v50 = vpop.f32.mrb[5].mxu0  ;;  %v722_v51 = vpop.f32.mrb[4].mxu1 }
 0x127   : >> { %v614_v52 = vpop.f32.mrb[6].mxu0  ;;  %v1958_v53 = vpop.f32.mrb[5].mxu1 }
 0x128   : >> { %v728_v54 = vadd.f32 %v722_v51, %v617_v49  ;;  %v1939_v55 = vpop.f32.mrb[7].mxu0  ;;  %v725_v56 = vpop.f32.mrb[6].mxu1 }
 0x129   : >> { %v1959_v57 = vpop.f32.mrb[7].mxu1 }
 0x145   : >> { %v832_v58 = vpop.f32.mrb[8].mxu0 }
 0x146   : >> { %v838_v59 = vadd.f32 %v832_v58, %v728_v54  ;;  %v1978_v60 = vpop.f32.mrb[9].mxu0  ;;  %v953_v1 = vpop.f32.mrb[8].mxu1 }
 0x147   : >> { %v835_v61 = vpop.f32.mrb[10].mxu0  ;;  %v1998_v62 = vpop.f32.mrb[9].mxu1 }
 0x148   : >> { %v959_v63 = vadd.f32 %v953_v1, %v838_v59  ;;  %v1979_v0 = vpop.f32.mrb[11].mxu0  ;;  %v956_v2 = vpop.f32.mrb[10].mxu1 }
 0x149   : >> { %v1999_v3 = vpop.f32.mrb[11].mxu1 }
 0x165   : >> { %v1064_v4 = vpop.f32.mrb[12].mxu0 }
 0x166   : >> { %v1070_v5 = vadd.f32 %v1064_v4, %v959_v63  ;;  %v2018_v6 = vpop.f32.mrb[13].mxu0  ;;  %v1174_v7 = vpop.f32.mrb[12].mxu1 }
 0x167   : >> { %v1067_v8 = vpop.f32.mrb[14].mxu0  ;;  %v2038_v9 = vpop.f32.mrb[13].mxu1 }
 0x168   : >> { %v1180_v10 = vadd.f32 %v1174_v7, %v1070_v5  ;;  %v2019_v11 = vpop.f32.mrb[15].mxu0  ;;  %v1177_v12 = vpop.f32.mrb[14].mxu1 }
 0x169   : >> { %v2039_v13 = vpop.f32.mrb[15].mxu1 }
 0x185   : >> { %v1295_v14 = vpop.f32.mrb[16].mxu0 }
 0x186   : >> { %v1301_v16 = vadd.f32 %v1295_v14, %v1180_v10  ;;  %v2058_v17 = vpop.f32.mrb[17].mxu0 }
 0x187   : >> { %v1298_v18 = vpop.f32.mrb[18].mxu0 }
 0x188   : >> { %v1309_v19 = vadd.f32 %v1766_v15, %v1301_v16  ;;  %v2059_v20 = vpop.f32.mrb[19].mxu0 }
 0x18a   : >> { %v1310_v21 = vmax.f32 %v1309_v19, 0.0 }
 0x18c   : >> { %v1311_v22 = vpack.c.bf16 %v1310_v21, %v1310_v21 }
 0x18e   : >> { %2077 = vmatmul.mubr.bf16.vlgmr.msra.gmra.mrb[16].mxu1 %v1311_v22 }
 0x260   : > { %277 = sbr.rel (!%p275_p4) target bundleno = 17 (0x11), region = 100 }
 0x261   : >> { %v1417_v24 = vpop.f32.mrb[16].mxu1 }
 0x262   : >> { %v1418_v26 = vadd.f32 %v1767_v23, %v1417_v24  ;;  %v2078_v27 = vpop.f32.mrb[17].mxu1 }
 0x263   : >> { %v1420_v28 = vpop.f32.mrb[18].mxu1 }
 0x264   : >> { %v1426_v29 = vadd.f32 %v1425_v25, %v1418_v26  ;;  %v2079_v30 = vpop.f32.mrb[19].mxu1 }
 0x266   : >> { %1428 = vst [vmem:[%s1427_s13] sm:$0xff] %v1426_v29 }
 0x267 PF: > { %s16_s21 = sadd.s32 1, %s2192_s21  }
 0x268   : > { %p13_p5 = scmp.ge.s32.totalorder %s16_s21, 4  }
 0x26a   :  { %15 = sbr.rel (!%p13_p5) target bundleno = 1 (0x1), region = 111 }

</bundles_post_ra>
